<compile_context>
chip_gen: v7x
topology: tpu7x:2x2x1
jax: 0.10.0
libtpu: 0.0.40
codegen_flags: <defaults>
</compile_context>

<pallas_src>
import jax
import jax.numpy as jnp
from jax.experimental import pallas as pl
from jax.experimental.pallas import tpu as pltpu


def rnn_kernel(xT_ref, wih0_ref, whh0_ref, b0_ref, w1_ref, b1_ref,
               wfc_ref, bfc_ref, out_ref):
    S, B = xT_ref.shape
    H = whh0_ref.shape[0]

    xT = xT_ref[...]        # (S, B)   input, time-major (layout plumbing)
    wih0 = wih0_ref[...]    # (1, H)   == W_ih_l0^T  (input_size == 1)
    whh0 = whh0_ref[...]    # (H, H)   == W_hh_l0^T
    b0 = b0_ref[...]        # (1, H)   == b_ih_l0 + b_hh_l0
    w1 = w1_ref[...]        # (2H, H)  == [W_ih_l1^T ; W_hh_l1^T]  (fused)
    b1 = b1_ref[...]        # (1, H)   == b_ih_l1 + b_hh_l1
    wfc = wfc_ref[...]      # (H, 1)   == fc.weight^T
    bfc = bfc_ref[...]      # (1, 1)   == fc.bias

    # Hoisted per-timestep input contribution (+ layer-0 bias), S leading so
    # the per-step access is a static leading-axis slice (no lane slicing).
    xwb = xT[:, :, None] * wih0[None, :, :] + b0[None, :, :]   # (S, B, H)

    # Hoisted layer-1 bias broadcast (JAX does not CSE broadcasts in loops).
    b1b = jnp.broadcast_to(b1, (B, H))

    h1 = jnp.zeros((B, H), jnp.float32)
    h2 = jnp.zeros((B, H), jnp.float32)

    # Fully unrolled recurrence; all indices are compile-time constants.
    for t in range(S):
        # Layer 0: h1 <- tanh(x_t W_ih0^T + b0 + h1 W_hh0^T)   (VPU MAC)
        pre1 = xwb[t]                                      # (B, H)
        for k in range(H):
            pre1 = pre1 + h1[:, k:k + 1] * whh0[k:k + 1, :]
        h1 = jnp.tanh(pre1)

        # Layer 1 (fused): h2 <- tanh([h1, h2] @ [W_ih1^T ; W_hh1^T] + b1)
        pre2 = b1b
        for k in range(H):
            pre2 = pre2 + h1[:, k:k + 1] * w1[k:k + 1, :]
        for k in range(H):
            pre2 = pre2 + h2[:, k:k + 1] * w1[H + k:H + k + 1, :]
        h2 = jnp.tanh(pre2)

    # Final Linear(hidden -> 1) on the last-step top-layer hidden state.
    out = jnp.broadcast_to(bfc, (B, 1))
    for k in range(H):
        out = out + h2[:, k:k + 1] * wfc[k:k + 1, :]
    out_ref[...] = out


def rnn_forward(x, params):
    B, S = x.shape
    vmem = pl.BlockSpec(memory_space=pltpu.MemorySpace.VMEM)
    out = pl.pallas_call(
        rnn_kernel,
        out_shape=jax.ShapeDtypeStruct((B, 1), jnp.float32),
        in_specs=[vmem] * 8,
        out_specs=vmem,
    )(x.T,   # (S, B): time-major so per-step slicing is on the leading axis
      params["wih0"], params["whh0"], params["b0"],
      params["w1"], params["b1"],
      params["wfc"], params["bfc"])
    return out[:, 0]   # squeeze(1) -> (batch,)


def init_params(key, input_size=1, hidden_size=4):
    """Deterministic init matching PyTorch shapes: U(-1/sqrt(H), 1/sqrt(H))."""
    H = hidden_size
    bound = 1.0 / jnp.sqrt(jnp.float32(H))
    ks = jax.random.split(key, 10)
    u = lambda k, shape: jax.random.uniform(k, shape, jnp.float32, -bound, bound)

    w_ih_l0 = u(ks[0], (H, input_size))
    w_hh_l0 = u(ks[1], (H, H))
    b_ih_l0 = u(ks[2], (H,))
    b_hh_l0 = u(ks[3], (H,))
    w_ih_l1 = u(ks[4], (H, H))
    w_hh_l1 = u(ks[5], (H, H))
    b_ih_l1 = u(ks[6], (H,))
    b_hh_l1 = u(ks[7], (H,))
    fc_w = u(ks[8], (1, H))
    fc_b = u(ks[9], (1,))

    return {
        "wih0": w_ih_l0.T,                                        # (1, H)
        "whh0": w_hh_l0.T,                                        # (H, H)
        "b0": (b_ih_l0 + b_hh_l0).reshape(1, H),                  # (1, H)
        "w1": jnp.concatenate([w_ih_l1.T, w_hh_l1.T], axis=0),    # (2H, H) fused
        "b1": (b_ih_l1 + b_hh_l1).reshape(1, H),                  # (1, H)
        "wfc": fc_w.T,                                            # (H, 1)
        "bfc": fc_b.reshape(1, 1),                                # (1, 1)
    }


def rnn_forward_ref(x, params):
    """Pure-JAX reference mirroring torch.nn.RNN (tanh) + fc, for validation."""
    B, S = x.shape
    H = params["whh0"].shape[0]
    wih1 = params["w1"][:H]
    whh1 = params["w1"][H:]
    h1 = jnp.zeros((B, H), jnp.float32)
    h2 = jnp.zeros((B, H), jnp.float32)
    for t in range(S):
        x_t = x[:, t:t + 1]
        h1 = jnp.tanh(x_t * params["wih0"] + h1 @ params["whh0"] + params["b0"])
        h2 = jnp.tanh(h1 @ wih1 + h2 @ whh1 + params["b1"])
    return (h2 @ params["wfc"] + params["bfc"])[:, 0]


if __name__ == "__main__":
    key = jax.random.PRNGKey(0)
    kx, kp = jax.random.split(key)

    batch, seq = 2, 8
    x = jax.random.normal(kx, (batch, seq), jnp.float32)
    params = init_params(kp, input_size=1, hidden_size=4)

    out = jax.block_until_ready(rnn_forward(x, params))
    ref = rnn_forward_ref(x, params)

    assert out.shape == (batch,)
    assert jnp.allclose(out, ref, atol=1e-5, rtol=1e-5), (out, ref)
    print("KERNEL_OK")
</pallas_src>

<mosaic_0001>
module attributes {stable_mosaic.version = 11 : i64} {
  func.func @rnn_kernel(%arg0: memref<8x2xf32, #tpu.memory_space<vmem>>, %arg1: memref<1x4xf32, #tpu.memory_space<vmem>>, %arg2: memref<4x4xf32, #tpu.memory_space<vmem>>, %arg3: memref<1x4xf32, #tpu.memory_space<vmem>>, %arg4: memref<8x4xf32, #tpu.memory_space<vmem>>, %arg5: memref<1x4xf32, #tpu.memory_space<vmem>>, %arg6: memref<4x1xf32, #tpu.memory_space<vmem>>, %arg7: memref<1x1xf32, #tpu.memory_space<vmem>>, %arg8: memref<2x1xf32, #tpu.memory_space<vmem>>) attributes {dimension_semantics = [], scalar_prefetch = 0 : i64, scratch_operands = 0 : i64, tpu.core_type = #tpu.core_type<tc>} {
    %c0 = arith.constant 0 : index
    %c0_0 = arith.constant 0 : index
    %0 = vector.load %arg0[%c0, %c0_0] : memref<8x2xf32, #tpu.memory_space<vmem>>, vector<8x2xf32>
    %c0_1 = arith.constant 0 : index
    %c0_2 = arith.constant 0 : index
    %1 = vector.load %arg1[%c0_1, %c0_2] : memref<1x4xf32, #tpu.memory_space<vmem>>, vector<1x4xf32>
    %c0_3 = arith.constant 0 : index
    %c0_4 = arith.constant 0 : index
    %2 = vector.load %arg2[%c0_3, %c0_4] : memref<4x4xf32, #tpu.memory_space<vmem>>, vector<4x4xf32>
    %c0_5 = arith.constant 0 : index
    %c0_6 = arith.constant 0 : index
    %3 = vector.load %arg3[%c0_5, %c0_6] : memref<1x4xf32, #tpu.memory_space<vmem>>, vector<1x4xf32>
    %c0_7 = arith.constant 0 : index
    %c0_8 = arith.constant 0 : index
    %4 = vector.load %arg4[%c0_7, %c0_8] : memref<8x4xf32, #tpu.memory_space<vmem>>, vector<8x4xf32>
    %c0_9 = arith.constant 0 : index
    %c0_10 = arith.constant 0 : index
    %5 = vector.load %arg5[%c0_9, %c0_10] : memref<1x4xf32, #tpu.memory_space<vmem>>, vector<1x4xf32>
    %c0_11 = arith.constant 0 : index
    %c0_12 = arith.constant 0 : index
    %6 = vector.load %arg6[%c0_11, %c0_12] : memref<4x1xf32, #tpu.memory_space<vmem>>, vector<4x1xf32>
    %c0_13 = arith.constant 0 : index
    %c0_14 = arith.constant 0 : index
    %7 = vector.load %arg7[%c0_13, %c0_14] : memref<1x1xf32, #tpu.memory_space<vmem>>, vector<1x1xf32>
    %8 = vector.shape_cast %0 : vector<8x2xf32> to vector<8x2x1xf32>
    %9 = vector.shape_cast %1 : vector<1x4xf32> to vector<1x1x4xf32>
    %10 = vector.broadcast %8 : vector<8x2x1xf32> to vector<8x2x4xf32>
    %11 = vector.broadcast %9 : vector<1x1x4xf32> to vector<8x2x4xf32>
    %12 = arith.mulf %10, %11 : vector<8x2x4xf32>
    %13 = vector.shape_cast %3 : vector<1x4xf32> to vector<1x1x4xf32>
    %14 = vector.broadcast %13 : vector<1x1x4xf32> to vector<8x2x4xf32>
    %15 = arith.addf %12, %14 : vector<8x2x4xf32>
    %16 = vector.shape_cast %5 : vector<1x4xf32> to vector<1x4xf32>
    %17 = vector.broadcast %16 : vector<1x4xf32> to vector<2x4xf32>
    %cst = arith.constant 0.000000e+00 : f32
    %18 = vector.broadcast %cst : f32 to vector<2x4xf32>
    %cst_15 = arith.constant 0.000000e+00 : f32
    %19 = vector.broadcast %cst_15 : f32 to vector<2x4xf32>
    %20 = vector.extract_strided_slice %15 {offsets = [0, 0, 0], sizes = [1, 2, 4], strides = [1, 1, 1]} : vector<8x2x4xf32> to vector<1x2x4xf32>
    %21 = vector.shape_cast %20 : vector<1x2x4xf32> to vector<2x4xf32>
    %22 = vector.extract_strided_slice %18 {offsets = [0, 0], sizes = [2, 1], strides = [1, 1]} : vector<2x4xf32> to vector<2x1xf32>
    %23 = vector.extract_strided_slice %2 {offsets = [0, 0], sizes = [1, 4], strides = [1, 1]} : vector<4x4xf32> to vector<1x4xf32>
    %24 = vector.broadcast %22 : vector<2x1xf32> to vector<2x4xf32>
    %25 = vector.broadcast %23 : vector<1x4xf32> to vector<2x4xf32>
    %26 = arith.mulf %24, %25 : vector<2x4xf32>
    %27 = arith.addf %21, %26 : vector<2x4xf32>
    %28 = vector.extract_strided_slice %18 {offsets = [0, 1], sizes = [2, 1], strides = [1, 1]} : vector<2x4xf32> to vector<2x1xf32>
    %29 = vector.extract_strided_slice %2 {offsets = [1, 0], sizes = [1, 4], strides = [1, 1]} : vector<4x4xf32> to vector<1x4xf32>
    %30 = vector.broadcast %28 : vector<2x1xf32> to vector<2x4xf32>
    %31 = vector.broadcast %29 : vector<1x4xf32> to vector<2x4xf32>
    %32 = arith.mulf %30, %31 : vector<2x4xf32>
    %33 = arith.addf %27, %32 : vector<2x4xf32>
    %34 = vector.extract_strided_slice %18 {offsets = [0, 2], sizes = [2, 1], strides = [1, 1]} : vector<2x4xf32> to vector<2x1xf32>
    %35 = vector.extract_strided_slice %2 {offsets = [2, 0], sizes = [1, 4], strides = [1, 1]} : vector<4x4xf32> to vector<1x4xf32>
    %36 = vector.broadcast %34 : vector<2x1xf32> to vector<2x4xf32>
    %37 = vector.broadcast %35 : vector<1x4xf32> to vector<2x4xf32>
    %38 = arith.mulf %36, %37 : vector<2x4xf32>
    %39 = arith.addf %33, %38 : vector<2x4xf32>
    %40 = vector.extract_strided_slice %18 {offsets = [0, 3], sizes = [2, 1], strides = [1, 1]} : vector<2x4xf32> to vector<2x1xf32>
    %41 = vector.extract_strided_slice %2 {offsets = [3, 0], sizes = [1, 4], strides = [1, 1]} : vector<4x4xf32> to vector<1x4xf32>
    %42 = vector.broadcast %40 : vector<2x1xf32> to vector<2x4xf32>
    %43 = vector.broadcast %41 : vector<1x4xf32> to vector<2x4xf32>
    %44 = arith.mulf %42, %43 : vector<2x4xf32>
    %45 = arith.addf %39, %44 : vector<2x4xf32>
    %46 = math.tanh %45 : vector<2x4xf32>
    %47 = vector.extract_strided_slice %46 {offsets = [0, 0], sizes = [2, 1], strides = [1, 1]} : vector<2x4xf32> to vector<2x1xf32>
    %48 = vector.extract_strided_slice %4 {offsets = [0, 0], sizes = [1, 4], strides = [1, 1]} : vector<8x4xf32> to vector<1x4xf32>
    %49 = vector.broadcast %47 : vector<2x1xf32> to vector<2x4xf32>
    %50 = vector.broadcast %48 : vector<1x4xf32> to vector<2x4xf32>
    %51 = arith.mulf %49, %50 : vector<2x4xf32>
    %52 = arith.addf %17, %51 : vector<2x4xf32>
    %53 = vector.extract_strided_slice %46 {offsets = [0, 1], sizes = [2, 1], strides = [1, 1]} : vector<2x4xf32> to vector<2x1xf32>
    %54 = vector.extract_strided_slice %4 {offsets = [1, 0], sizes = [1, 4], strides = [1, 1]} : vector<8x4xf32> to vector<1x4xf32>
    %55 = vector.broadcast %53 : vector<2x1xf32> to vector<2x4xf32>
    %56 = vector.broadcast %54 : vector<1x4xf32> to vector<2x4xf32>
    %57 = arith.mulf %55, %56 : vector<2x4xf32>
    %58 = arith.addf %52, %57 : vector<2x4xf32>
    %59 = vector.extract_strided_slice %46 {offsets = [0, 2], sizes = [2, 1], strides = [1, 1]} : vector<2x4xf32> to vector<2x1xf32>
    %60 = vector.extract_strided_slice %4 {offsets = [2, 0], sizes = [1, 4], strides = [1, 1]} : vector<8x4xf32> to vector<1x4xf32>
    %61 = vector.broadcast %59 : vector<2x1xf32> to vector<2x4xf32>
    %62 = vector.broadcast %60 : vector<1x4xf32> to vector<2x4xf32>
    %63 = arith.mulf %61, %62 : vector<2x4xf32>
    %64 = arith.addf %58, %63 : vector<2x4xf32>
    %65 = vector.extract_strided_slice %46 {offsets = [0, 3], sizes = [2, 1], strides = [1, 1]} : vector<2x4xf32> to vector<2x1xf32>
    %66 = vector.extract_strided_slice %4 {offsets = [3, 0], sizes = [1, 4], strides = [1, 1]} : vector<8x4xf32> to vector<1x4xf32>
    %67 = vector.broadcast %65 : vector<2x1xf32> to vector<2x4xf32>
    %68 = vector.broadcast %66 : vector<1x4xf32> to vector<2x4xf32>
    %69 = arith.mulf %67, %68 : vector<2x4xf32>
    %70 = arith.addf %64, %69 : vector<2x4xf32>
    %71 = vector.extract_strided_slice %19 {offsets = [0, 0], sizes = [2, 1], strides = [1, 1]} : vector<2x4xf32> to vector<2x1xf32>
    %72 = vector.extract_strided_slice %4 {offsets = [4, 0], sizes = [1, 4], strides = [1, 1]} : vector<8x4xf32> to vector<1x4xf32>
    %73 = vector.broadcast %71 : vector<2x1xf32> to vector<2x4xf32>
    %74 = vector.broadcast %72 : vector<1x4xf32> to vector<2x4xf32>
    %75 = arith.mulf %73, %74 : vector<2x4xf32>
    %76 = arith.addf %70, %75 : vector<2x4xf32>
    %77 = vector.extract_strided_slice %19 {offsets = [0, 1], sizes = [2, 1], strides = [1, 1]} : vector<2x4xf32> to vector<2x1xf32>
    %78 = vector.extract_strided_slice %4 {offsets = [5, 0], sizes = [1, 4], strides = [1, 1]} : vector<8x4xf32> to vector<1x4xf32>
    %79 = vector.broadcast %77 : vector<2x1xf32> to vector<2x4xf32>
    %80 = vector.broadcast %78 : vector<1x4xf32> to vector<2x4xf32>
    %81 = arith.mulf %79, %80 : vector<2x4xf32>
    %82 = arith.addf %76, %81 : vector<2x4xf32>
    %83 = vector.extract_strided_slice %19 {offsets = [0, 2], sizes = [2, 1], strides = [1, 1]} : vector<2x4xf32> to vector<2x1xf32>
    %84 = vector.extract_strided_slice %4 {offsets = [6, 0], sizes = [1, 4], strides = [1, 1]} : vector<8x4xf32> to vector<1x4xf32>
    %85 = vector.broadcast %83 : vector<2x1xf32> to vector<2x4xf32>
    %86 = vector.broadcast %84 : vector<1x4xf32> to vector<2x4xf32>
    %87 = arith.mulf %85, %86 : vector<2x4xf32>
    %88 = arith.addf %82, %87 : vector<2x4xf32>
    %89 = vector.extract_strided_slice %19 {offsets = [0, 3], sizes = [2, 1], strides = [1, 1]} : vector<2x4xf32> to vector<2x1xf32>
    %90 = vector.extract_strided_slice %4 {offsets = [7, 0], sizes = [1, 4], strides = [1, 1]} : vector<8x4xf32> to vector<1x4xf32>
    %91 = vector.broadcast %89 : vector<2x1xf32> to vector<2x4xf32>
    %92 = vector.broadcast %90 : vector<1x4xf32> to vector<2x4xf32>
    %93 = arith.mulf %91, %92 : vector<2x4xf32>
    %94 = arith.addf %88, %93 : vector<2x4xf32>
    %95 = math.tanh %94 : vector<2x4xf32>
    %96 = vector.extract_strided_slice %15 {offsets = [1, 0, 0], sizes = [1, 2, 4], strides = [1, 1, 1]} : vector<8x2x4xf32> to vector<1x2x4xf32>
    %97 = vector.shape_cast %96 : vector<1x2x4xf32> to vector<2x4xf32>
    %98 = vector.extract_strided_slice %46 {offsets = [0, 0], sizes = [2, 1], strides = [1, 1]} : vector<2x4xf32> to vector<2x1xf32>
    %99 = vector.extract_strided_slice %2 {offsets = [0, 0], sizes = [1, 4], strides = [1, 1]} : vector<4x4xf32> to vector<1x4xf32>
    %100 = vector.broadcast %98 : vector<2x1xf32> to vector<2x4xf32>
    %101 = vector.broadcast %99 : vector<1x4xf32> to vector<2x4xf32>
    %102 = arith.mulf %100, %101 : vector<2x4xf32>
    %103 = arith.addf %97, %102 : vector<2x4xf32>
    %104 = vector.extract_strided_slice %46 {offsets = [0, 1], sizes = [2, 1], strides = [1, 1]} : vector<2x4xf32> to vector<2x1xf32>
    %105 = vector.extract_strided_slice %2 {offsets = [1, 0], sizes = [1, 4], strides = [1, 1]} : vector<4x4xf32> to vector<1x4xf32>
    %106 = vector.broadcast %104 : vector<2x1xf32> to vector<2x4xf32>
    %107 = vector.broadcast %105 : vector<1x4xf32> to vector<2x4xf32>
    %108 = arith.mulf %106, %107 : vector<2x4xf32>
    %109 = arith.addf %103, %108 : vector<2x4xf32>
    %110 = vector.extract_strided_slice %46 {offsets = [0, 2], sizes = [2, 1], strides = [1, 1]} : vector<2x4xf32> to vector<2x1xf32>
    %111 = vector.extract_strided_slice %2 {offsets = [2, 0], sizes = [1, 4], strides = [1, 1]} : vector<4x4xf32> to vector<1x4xf32>
    %112 = vector.broadcast %110 : vector<2x1xf32> to vector<2x4xf32>
    %113 = vector.broadcast %111 : vector<1x4xf32> to vector<2x4xf32>
    %114 = arith.mulf %112, %113 : vector<2x4xf32>
    %115 = arith.addf %109, %114 : vector<2x4xf32>
    %116 = vector.extract_strided_slice %46 {offsets = [0, 3], sizes = [2, 1], strides = [1, 1]} : vector<2x4xf32> to vector<2x1xf32>
    %117 = vector.extract_strided_slice %2 {offsets = [3, 0], sizes = [1, 4], strides = [1, 1]} : vector<4x4xf32> to vector<1x4xf32>
    %118 = vector.broadcast %116 : vector<2x1xf32> to vector<2x4xf32>
    %119 = vector.broadcast %117 : vector<1x4xf32> to vector<2x4xf32>
    %120 = arith.mulf %118, %119 : vector<2x4xf32>
    %121 = arith.addf %115, %120 : vector<2x4xf32>
    %122 = math.tanh %121 : vector<2x4xf32>
    %123 = vector.extract_strided_slice %122 {offsets = [0, 0], sizes = [2, 1], strides = [1, 1]} : vector<2x4xf32> to vector<2x1xf32>
    %124 = vector.extract_strided_slice %4 {offsets = [0, 0], sizes = [1, 4], strides = [1, 1]} : vector<8x4xf32> to vector<1x4xf32>
    %125 = vector.broadcast %123 : vector<2x1xf32> to vector<2x4xf32>
    %126 = vector.broadcast %124 : vector<1x4xf32> to vector<2x4xf32>
    %127 = arith.mulf %125, %126 : vector<2x4xf32>
    %128 = arith.addf %17, %127 : vector<2x4xf32>
    %129 = vector.extract_strided_slice %122 {offsets = [0, 1], sizes = [2, 1], strides = [1, 1]} : vector<2x4xf32> to vector<2x1xf32>
    %130 = vector.extract_strided_slice %4 {offsets = [1, 0], sizes = [1, 4], strides = [1, 1]} : vector<8x4xf32> to vector<1x4xf32>
    %131 = vector.broadcast %129 : vector<2x1xf32> to vector<2x4xf32>
    %132 = vector.broadcast %130 : vector<1x4xf32> to vector<2x4xf32>
    %133 = arith.mulf %131, %132 : vector<2x4xf32>
    %134 = arith.addf %128, %133 : vector<2x4xf32>
    %135 = vector.extract_strided_slice %122 {offsets = [0, 2], sizes = [2, 1], strides = [1, 1]} : vector<2x4xf32> to vector<2x1xf32>
    %136 = vector.extract_strided_slice %4 {offsets = [2, 0], sizes = [1, 4], strides = [1, 1]} : vector<8x4xf32> to vector<1x4xf32>
    %137 = vector.broadcast %135 : vector<2x1xf32> to vector<2x4xf32>
    %138 = vector.broadcast %136 : vector<1x4xf32> to vector<2x4xf32>
    %139 = arith.mulf %137, %138 : vector<2x4xf32>
    %140 = arith.addf %134, %139 : vector<2x4xf32>
    %141 = vector.extract_strided_slice %122 {offsets = [0, 3], sizes = [2, 1], strides = [1, 1]} : vector<2x4xf32> to vector<2x1xf32>
    %142 = vector.extract_strided_slice %4 {offsets = [3, 0], sizes = [1, 4], strides = [1, 1]} : vector<8x4xf32> to vector<1x4xf32>
    %143 = vector.broadcast %141 : vector<2x1xf32> to vector<2x4xf32>
    %144 = vector.broadcast %142 : vector<1x4xf32> to vector<2x4xf32>
    %145 = arith.mulf %143, %144 : vector<2x4xf32>
    %146 = arith.addf %140, %145 : vector<2x4xf32>
    %147 = vector.extract_strided_slice %95 {offsets = [0, 0], sizes = [2, 1], strides = [1, 1]} : vector<2x4xf32> to vector<2x1xf32>
    %148 = vector.extract_strided_slice %4 {offsets = [4, 0], sizes = [1, 4], strides = [1, 1]} : vector<8x4xf32> to vector<1x4xf32>
    %149 = vector.broadcast %147 : vector<2x1xf32> to vector<2x4xf32>
    %150 = vector.broadcast %148 : vector<1x4xf32> to vector<2x4xf32>
    %151 = arith.mulf %149, %150 : vector<2x4xf32>
    %152 = arith.addf %146, %151 : vector<2x4xf32>
    %153 = vector.extract_strided_slice %95 {offsets = [0, 1], sizes = [2, 1], strides = [1, 1]} : vector<2x4xf32> to vector<2x1xf32>
    %154 = vector.extract_strided_slice %4 {offsets = [5, 0], sizes = [1, 4], strides = [1, 1]} : vector<8x4xf32> to vector<1x4xf32>
    %155 = vector.broadcast %153 : vector<2x1xf32> to vector<2x4xf32>
    %156 = vector.broadcast %154 : vector<1x4xf32> to vector<2x4xf32>
    %157 = arith.mulf %155, %156 : vector<2x4xf32>
    %158 = arith.addf %152, %157 : vector<2x4xf32>
    %159 = vector.extract_strided_slice %95 {offsets = [0, 2], sizes = [2, 1], strides = [1, 1]} : vector<2x4xf32> to vector<2x1xf32>
    %160 = vector.extract_strided_slice %4 {offsets = [6, 0], sizes = [1, 4], strides = [1, 1]} : vector<8x4xf32> to vector<1x4xf32>
    %161 = vector.broadcast %159 : vector<2x1xf32> to vector<2x4xf32>
    %162 = vector.broadcast %160 : vector<1x4xf32> to vector<2x4xf32>
    %163 = arith.mulf %161, %162 : vector<2x4xf32>
    %164 = arith.addf %158, %163 : vector<2x4xf32>
    %165 = vector.extract_strided_slice %95 {offsets = [0, 3], sizes = [2, 1], strides = [1, 1]} : vector<2x4xf32> to vector<2x1xf32>
    %166 = vector.extract_strided_slice %4 {offsets = [7, 0], sizes = [1, 4], strides = [1, 1]} : vector<8x4xf32> to vector<1x4xf32>
    %167 = vector.broadcast %165 : vector<2x1xf32> to vector<2x4xf32>
    %168 = vector.broadcast %166 : vector<1x4xf32> to vector<2x4xf32>
    %169 = arith.mulf %167, %168 : vector<2x4xf32>
    %170 = arith.addf %164, %169 : vector<2x4xf32>
    %171 = math.tanh %170 : vector<2x4xf32>
    %172 = vector.extract_strided_slice %15 {offsets = [2, 0, 0], sizes = [1, 2, 4], strides = [1, 1, 1]} : vector<8x2x4xf32> to vector<1x2x4xf32>
    %173 = vector.shape_cast %172 : vector<1x2x4xf32> to vector<2x4xf32>
    %174 = vector.extract_strided_slice %122 {offsets = [0, 0], sizes = [2, 1], strides = [1, 1]} : vector<2x4xf32> to vector<2x1xf32>
    %175 = vector.extract_strided_slice %2 {offsets = [0, 0], sizes = [1, 4], strides = [1, 1]} : vector<4x4xf32> to vector<1x4xf32>
    %176 = vector.broadcast %174 : vector<2x1xf32> to vector<2x4xf32>
    %177 = vector.broadcast %175 : vector<1x4xf32> to vector<2x4xf32>
    %178 = arith.mulf %176, %177 : vector<2x4xf32>
    %179 = arith.addf %173, %178 : vector<2x4xf32>
    %180 = vector.extract_strided_slice %122 {offsets = [0, 1], sizes = [2, 1], strides = [1, 1]} : vector<2x4xf32> to vector<2x1xf32>
    %181 = vector.extract_strided_slice %2 {offsets = [1, 0], sizes = [1, 4], strides = [1, 1]} : vector<4x4xf32> to vector<1x4xf32>
    %182 = vector.broadcast %180 : vector<2x1xf32> to vector<2x4xf32>
    %183 = vector.broadcast %181 : vector<1x4xf32> to vector<2x4xf32>
    %184 = arith.mulf %182, %183 : vector<2x4xf32>
    %185 = arith.addf %179, %184 : vector<2x4xf32>
    %186 = vector.extract_strided_slice %122 {offsets = [0, 2], sizes = [2, 1], strides = [1, 1]} : vector<2x4xf32> to vector<2x1xf32>
    %187 = vector.extract_strided_slice %2 {offsets = [2, 0], sizes = [1, 4], strides = [1, 1]} : vector<4x4xf32> to vector<1x4xf32>
    %188 = vector.broadcast %186 : vector<2x1xf32> to vector<2x4xf32>
    %189 = vector.broadcast %187 : vector<1x4xf32> to vector<2x4xf32>
    %190 = arith.mulf %188, %189 : vector<2x4xf32>
    %191 = arith.addf %185, %190 : vector<2x4xf32>
    %192 = vector.extract_strided_slice %122 {offsets = [0, 3], sizes = [2, 1], strides = [1, 1]} : vector<2x4xf32> to vector<2x1xf32>
    %193 = vector.extract_strided_slice %2 {offsets = [3, 0], sizes = [1, 4], strides = [1, 1]} : vector<4x4xf32> to vector<1x4xf32>
    %194 = vector.broadcast %192 : vector<2x1xf32> to vector<2x4xf32>
    %195 = vector.broadcast %193 : vector<1x4xf32> to vector<2x4xf32>
    %196 = arith.mulf %194, %195 : vector<2x4xf32>
    %197 = arith.addf %191, %196 : vector<2x4xf32>
    %198 = math.tanh %197 : vector<2x4xf32>
    %199 = vector.extract_strided_slice %198 {offsets = [0, 0], sizes = [2, 1], strides = [1, 1]} : vector<2x4xf32> to vector<2x1xf32>
    %200 = vector.extract_strided_slice %4 {offsets = [0, 0], sizes = [1, 4], strides = [1, 1]} : vector<8x4xf32> to vector<1x4xf32>
    %201 = vector.broadcast %199 : vector<2x1xf32> to vector<2x4xf32>
    %202 = vector.broadcast %200 : vector<1x4xf32> to vector<2x4xf32>
    %203 = arith.mulf %201, %202 : vector<2x4xf32>
    %204 = arith.addf %17, %203 : vector<2x4xf32>
    %205 = vector.extract_strided_slice %198 {offsets = [0, 1], sizes = [2, 1], strides = [1, 1]} : vector<2x4xf32> to vector<2x1xf32>
    %206 = vector.extract_strided_slice %4 {offsets = [1, 0], sizes = [1, 4], strides = [1, 1]} : vector<8x4xf32> to vector<1x4xf32>
    %207 = vector.broadcast %205 : vector<2x1xf32> to vector<2x4xf32>
    %208 = vector.broadcast %206 : vector<1x4xf32> to vector<2x4xf32>
    %209 = arith.mulf %207, %208 : vector<2x4xf32>
    %210 = arith.addf %204, %209 : vector<2x4xf32>
    %211 = vector.extract_strided_slice %198 {offsets = [0, 2], sizes = [2, 1], strides = [1, 1]} : vector<2x4xf32> to vector<2x1xf32>
    %212 = vector.extract_strided_slice %4 {offsets = [2, 0], sizes = [1, 4], strides = [1, 1]} : vector<8x4xf32> to vector<1x4xf32>
    %213 = vector.broadcast %211 : vector<2x1xf32> to vector<2x4xf32>
    %214 = vector.broadcast %212 : vector<1x4xf32> to vector<2x4xf32>
    %215 = arith.mulf %213, %214 : vector<2x4xf32>
    %216 = arith.addf %210, %215 : vector<2x4xf32>
    %217 = vector.extract_strided_slice %198 {offsets = [0, 3], sizes = [2, 1], strides = [1, 1]} : vector<2x4xf32> to vector<2x1xf32>
    %218 = vector.extract_strided_slice %4 {offsets = [3, 0], sizes = [1, 4], strides = [1, 1]} : vector<8x4xf32> to vector<1x4xf32>
    %219 = vector.broadcast %217 : vector<2x1xf32> to vector<2x4xf32>
    %220 = vector.broadcast %218 : vector<1x4xf32> to vector<2x4xf32>
    %221 = arith.mulf %219, %220 : vector<2x4xf32>
    %222 = arith.addf %216, %221 : vector<2x4xf32>
    %223 = vector.extract_strided_slice %171 {offsets = [0, 0], sizes = [2, 1], strides = [1, 1]} : vector<2x4xf32> to vector<2x1xf32>
    %224 = vector.extract_strided_slice %4 {offsets = [4, 0], sizes = [1, 4], strides = [1, 1]} : vector<8x4xf32> to vector<1x4xf32>
    %225 = vector.broadcast %223 : vector<2x1xf32> to vector<2x4xf32>
    %226 = vector.broadcast %224 : vector<1x4xf32> to vector<2x4xf32>
    %227 = arith.mulf %225, %226 : vector<2x4xf32>
    %228 = arith.addf %222, %227 : vector<2x4xf32>
    %229 = vector.extract_strided_slice %171 {offsets = [0, 1], sizes = [2, 1], strides = [1, 1]} : vector<2x4xf32> to vector<2x1xf32>
    %230 = vector.extract_strided_slice %4 {offsets = [5, 0], sizes = [1, 4], strides = [1, 1]} : vector<8x4xf32> to vector<1x4xf32>
    %231 = vector.broadcast %229 : vector<2x1xf32> to vector<2x4xf32>
    %232 = vector.broadcast %230 : vector<1x4xf32> to vector<2x4xf32>
    %233 = arith.mulf %231, %232 : vector<2x4xf32>
    %234 = arith.addf %228, %233 : vector<2x4xf32>
    %235 = vector.extract_strided_slice %171 {offsets = [0, 2], sizes = [2, 1], strides = [1, 1]} : vector<2x4xf32> to vector<2x1xf32>
    %236 = vector.extract_strided_slice %4 {offsets = [6, 0], sizes = [1, 4], strides = [1, 1]} : vector<8x4xf32> to vector<1x4xf32>
    %237 = vector.broadcast %235 : vector<2x1xf32> to vector<2x4xf32>
    %238 = vector.broadcast %236 : vector<1x4xf32> to vector<2x4xf32>
    %239 = arith.mulf %237, %238 : vector<2x4xf32>
    %240 = arith.addf %234, %239 : vector<2x4xf32>
    %241 = vector.extract_strided_slice %171 {offsets = [0, 3], sizes = [2, 1], strides = [1, 1]} : vector<2x4xf32> to vector<2x1xf32>
    %242 = vector.extract_strided_slice %4 {offsets = [7, 0], sizes = [1, 4], strides = [1, 1]} : vector<8x4xf32> to vector<1x4xf32>
    %243 = vector.broadcast %241 : vector<2x1xf32> to vector<2x4xf32>
    %244 = vector.broadcast %242 : vector<1x4xf32> to vector<2x4xf32>
    %245 = arith.mulf %243, %244 : vector<2x4xf32>
    %246 = arith.addf %240, %245 : vector<2x4xf32>
    %247 = math.tanh %246 : vector<2x4xf32>
    %248 = vector.extract_strided_slice %15 {offsets = [3, 0, 0], sizes = [1, 2, 4], strides = [1, 1, 1]} : vector<8x2x4xf32> to vector<1x2x4xf32>
    %249 = vector.shape_cast %248 : vector<1x2x4xf32> to vector<2x4xf32>
    %250 = vector.extract_strided_slice %198 {offsets = [0, 0], sizes = [2, 1], strides = [1, 1]} : vector<2x4xf32> to vector<2x1xf32>
    %251 = vector.extract_strided_slice %2 {offsets = [0, 0], sizes = [1, 4], strides = [1, 1]} : vector<4x4xf32> to vector<1x4xf32>
    %252 = vector.broadcast %250 : vector<2x1xf32> to vector<2x4xf32>
    %253 = vector.broadcast %251 : vector<1x4xf32> to vector<2x4xf32>
    %254 = arith.mulf %252, %253 : vector<2x4xf32>
    %255 = arith.addf %249, %254 : vector<2x4xf32>
    %256 = vector.extract_strided_slice %198 {offsets = [0, 1], sizes = [2, 1], strides = [1, 1]} : vector<2x4xf32> to vector<2x1xf32>
    %257 = vector.extract_strided_slice %2 {offsets = [1, 0], sizes = [1, 4], strides = [1, 1]} : vector<4x4xf32> to vector<1x4xf32>
    %258 = vector.broadcast %256 : vector<2x1xf32> to vector<2x4xf32>
    %259 = vector.broadcast %257 : vector<1x4xf32> to vector<2x4xf32>
    %260 = arith.mulf %258, %259 : vector<2x4xf32>
    %261 = arith.addf %255, %260 : vector<2x4xf32>
    %262 = vector.extract_strided_slice %198 {offsets = [0, 2], sizes = [2, 1], strides = [1, 1]} : vector<2x4xf32> to vector<2x1xf32>
    %263 = vector.extract_strided_slice %2 {offsets = [2, 0], sizes = [1, 4], strides = [1, 1]} : vector<4x4xf32> to vector<1x4xf32>
    %264 = vector.broadcast %262 : vector<2x1xf32> to vector<2x4xf32>
    %265 = vector.broadcast %263 : vector<1x4xf32> to vector<2x4xf32>
    %266 = arith.mulf %264, %265 : vector<2x4xf32>
    %267 = arith.addf %261, %266 : vector<2x4xf32>
    %268 = vector.extract_strided_slice %198 {offsets = [0, 3], sizes = [2, 1], strides = [1, 1]} : vector<2x4xf32> to vector<2x1xf32>
    %269 = vector.extract_strided_slice %2 {offsets = [3, 0], sizes = [1, 4], strides = [1, 1]} : vector<4x4xf32> to vector<1x4xf32>
    %270 = vector.broadcast %268 : vector<2x1xf32> to vector<2x4xf32>
    %271 = vector.broadcast %269 : vector<1x4xf32> to vector<2x4xf32>
    %272 = arith.mulf %270, %271 : vector<2x4xf32>
    %273 = arith.addf %267, %272 : vector<2x4xf32>
    %274 = math.tanh %273 : vector<2x4xf32>
    %275 = vector.extract_strided_slice %274 {offsets = [0, 0], sizes = [2, 1], strides = [1, 1]} : vector<2x4xf32> to vector<2x1xf32>
    %276 = vector.extract_strided_slice %4 {offsets = [0, 0], sizes = [1, 4], strides = [1, 1]} : vector<8x4xf32> to vector<1x4xf32>
    %277 = vector.broadcast %275 : vector<2x1xf32> to vector<2x4xf32>
    %278 = vector.broadcast %276 : vector<1x4xf32> to vector<2x4xf32>
    %279 = arith.mulf %277, %278 : vector<2x4xf32>
    %280 = arith.addf %17, %279 : vector<2x4xf32>
    %281 = vector.extract_strided_slice %274 {offsets = [0, 1], sizes = [2, 1], strides = [1, 1]} : vector<2x4xf32> to vector<2x1xf32>
    %282 = vector.extract_strided_slice %4 {offsets = [1, 0], sizes = [1, 4], strides = [1, 1]} : vector<8x4xf32> to vector<1x4xf32>
    %283 = vector.broadcast %281 : vector<2x1xf32> to vector<2x4xf32>
    %284 = vector.broadcast %282 : vector<1x4xf32> to vector<2x4xf32>
    %285 = arith.mulf %283, %284 : vector<2x4xf32>
    %286 = arith.addf %280, %285 : vector<2x4xf32>
    %287 = vector.extract_strided_slice %274 {offsets = [0, 2], sizes = [2, 1], strides = [1, 1]} : vector<2x4xf32> to vector<2x1xf32>
    %288 = vector.extract_strided_slice %4 {offsets = [2, 0], sizes = [1, 4], strides = [1, 1]} : vector<8x4xf32> to vector<1x4xf32>
    %289 = vector.broadcast %287 : vector<2x1xf32> to vector<2x4xf32>
    %290 = vector.broadcast %288 : vector<1x4xf32> to vector<2x4xf32>
    %291 = arith.mulf %289, %290 : vector<2x4xf32>
    %292 = arith.addf %286, %291 : vector<2x4xf32>
    %293 = vector.extract_strided_slice %274 {offsets = [0, 3], sizes = [2, 1], strides = [1, 1]} : vector<2x4xf32> to vector<2x1xf32>
    %294 = vector.extract_strided_slice %4 {offsets = [3, 0], sizes = [1, 4], strides = [1, 1]} : vector<8x4xf32> to vector<1x4xf32>
    %295 = vector.broadcast %293 : vector<2x1xf32> to vector<2x4xf32>
    %296 = vector.broadcast %294 : vector<1x4xf32> to vector<2x4xf32>
    %297 = arith.mulf %295, %296 : vector<2x4xf32>
    %298 = arith.addf %292, %297 : vector<2x4xf32>
    %299 = vector.extract_strided_slice %247 {offsets = [0, 0], sizes = [2, 1], strides = [1, 1]} : vector<2x4xf32> to vector<2x1xf32>
    %300 = vector.extract_strided_slice %4 {offsets = [4, 0], sizes = [1, 4], strides = [1, 1]} : vector<8x4xf32> to vector<1x4xf32>
    %301 = vector.broadcast %299 : vector<2x1xf32> to vector<2x4xf32>
    %302 = vector.broadcast %300 : vector<1x4xf32> to vector<2x4xf32>
    %303 = arith.mulf %301, %302 : vector<2x4xf32>
    %304 = arith.addf %298, %303 : vector<2x4xf32>
    %305 = vector.extract_strided_slice %247 {offsets = [0, 1], sizes = [2, 1], strides = [1, 1]} : vector<2x4xf32> to vector<2x1xf32>
    %306 = vector.extract_strided_slice %4 {offsets = [5, 0], sizes = [1, 4], strides = [1, 1]} : vector<8x4xf32> to vector<1x4xf32>
    %307 = vector.broadcast %305 : vector<2x1xf32> to vector<2x4xf32>
    %308 = vector.broadcast %306 : vector<1x4xf32> to vector<2x4xf32>
    %309 = arith.mulf %307, %308 : vector<2x4xf32>
    %310 = arith.addf %304, %309 : vector<2x4xf32>
    %311 = vector.extract_strided_slice %247 {offsets = [0, 2], sizes = [2, 1], strides = [1, 1]} : vector<2x4xf32> to vector<2x1xf32>
    %312 = vector.extract_strided_slice %4 {offsets = [6, 0], sizes = [1, 4], strides = [1, 1]} : vector<8x4xf32> to vector<1x4xf32>
    %313 = vector.broadcast %311 : vector<2x1xf32> to vector<2x4xf32>
    %314 = vector.broadcast %312 : vector<1x4xf32> to vector<2x4xf32>
    %315 = arith.mulf %313, %314 : vector<2x4xf32>
    %316 = arith.addf %310, %315 : vector<2x4xf32>
    %317 = vector.extract_strided_slice %247 {offsets = [0, 3], sizes = [2, 1], strides = [1, 1]} : vector<2x4xf32> to vector<2x1xf32>
    %318 = vector.extract_strided_slice %4 {offsets = [7, 0], sizes = [1, 4], strides = [1, 1]} : vector<8x4xf32> to vector<1x4xf32>
    %319 = vector.broadcast %317 : vector<2x1xf32> to vector<2x4xf32>
    %320 = vector.broadcast %318 : vector<1x4xf32> to vector<2x4xf32>
    %321 = arith.mulf %319, %320 : vector<2x4xf32>
    %322 = arith.addf %316, %321 : vector<2x4xf32>
    %323 = math.tanh %322 : vector<2x4xf32>
    %324 = vector.extract_strided_slice %15 {offsets = [4, 0, 0], sizes = [1, 2, 4], strides = [1, 1, 1]} : vector<8x2x4xf32> to vector<1x2x4xf32>
    %325 = vector.shape_cast %324 : vector<1x2x4xf32> to vector<2x4xf32>
    %326 = vector.extract_strided_slice %274 {offsets = [0, 0], sizes = [2, 1], strides = [1, 1]} : vector<2x4xf32> to vector<2x1xf32>
    %327 = vector.extract_strided_slice %2 {offsets = [0, 0], sizes = [1, 4], strides = [1, 1]} : vector<4x4xf32> to vector<1x4xf32>
    %328 = vector.broadcast %326 : vector<2x1xf32> to vector<2x4xf32>
    %329 = vector.broadcast %327 : vector<1x4xf32> to vector<2x4xf32>
    %330 = arith.mulf %328, %329 : vector<2x4xf32>
    %331 = arith.addf %325, %330 : vector<2x4xf32>
    %332 = vector.extract_strided_slice %274 {offsets = [0, 1], sizes = [2, 1], strides = [1, 1]} : vector<2x4xf32> to vector<2x1xf32>
    %333 = vector.extract_strided_slice %2 {offsets = [1, 0], sizes = [1, 4], strides = [1, 1]} : vector<4x4xf32> to vector<1x4xf32>
    %334 = vector.broadcast %332 : vector<2x1xf32> to vector<2x4xf32>
    %335 = vector.broadcast %333 : vector<1x4xf32> to vector<2x4xf32>
    %336 = arith.mulf %334, %335 : vector<2x4xf32>
    %337 = arith.addf %331, %336 : vector<2x4xf32>
    %338 = vector.extract_strided_slice %274 {offsets = [0, 2], sizes = [2, 1], strides = [1, 1]} : vector<2x4xf32> to vector<2x1xf32>
    %339 = vector.extract_strided_slice %2 {offsets = [2, 0], sizes = [1, 4], strides = [1, 1]} : vector<4x4xf32> to vector<1x4xf32>
    %340 = vector.broadcast %338 : vector<2x1xf32> to vector<2x4xf32>
    %341 = vector.broadcast %339 : vector<1x4xf32> to vector<2x4xf32>
    %342 = arith.mulf %340, %341 : vector<2x4xf32>
    %343 = arith.addf %337, %342 : vector<2x4xf32>
    %344 = vector.extract_strided_slice %274 {offsets = [0, 3], sizes = [2, 1], strides = [1, 1]} : vector<2x4xf32> to vector<2x1xf32>
    %345 = vector.extract_strided_slice %2 {offsets = [3, 0], sizes = [1, 4], strides = [1, 1]} : vector<4x4xf32> to vector<1x4xf32>
    %346 = vector.broadcast %344 : vector<2x1xf32> to vector<2x4xf32>
    %347 = vector.broadcast %345 : vector<1x4xf32> to vector<2x4xf32>
    %348 = arith.mulf %346, %347 : vector<2x4xf32>
    %349 = arith.addf %343, %348 : vector<2x4xf32>
    %350 = math.tanh %349 : vector<2x4xf32>
    %351 = vector.extract_strided_slice %350 {offsets = [0, 0], sizes = [2, 1], strides = [1, 1]} : vector<2x4xf32> to vector<2x1xf32>
    %352 = vector.extract_strided_slice %4 {offsets = [0, 0], sizes = [1, 4], strides = [1, 1]} : vector<8x4xf32> to vector<1x4xf32>
    %353 = vector.broadcast %351 : vector<2x1xf32> to vector<2x4xf32>
    %354 = vector.broadcast %352 : vector<1x4xf32> to vector<2x4xf32>
    %355 = arith.mulf %353, %354 : vector<2x4xf32>
    %356 = arith.addf %17, %355 : vector<2x4xf32>
    %357 = vector.extract_strided_slice %350 {offsets = [0, 1], sizes = [2, 1], strides = [1, 1]} : vector<2x4xf32> to vector<2x1xf32>
    %358 = vector.extract_strided_slice %4 {offsets = [1, 0], sizes = [1, 4], strides = [1, 1]} : vector<8x4xf32> to vector<1x4xf32>
    %359 = vector.broadcast %357 : vector<2x1xf32> to vector<2x4xf32>
    %360 = vector.broadcast %358 : vector<1x4xf32> to vector<2x4xf32>
    %361 = arith.mulf %359, %360 : vector<2x4xf32>
    %362 = arith.addf %356, %361 : vector<2x4xf32>
    %363 = vector.extract_strided_slice %350 {offsets = [0, 2], sizes = [2, 1], strides = [1, 1]} : vector<2x4xf32> to vector<2x1xf32>
    %364 = vector.extract_strided_slice %4 {offsets = [2, 0], sizes = [1, 4], strides = [1, 1]} : vector<8x4xf32> to vector<1x4xf32>
    %365 = vector.broadcast %363 : vector<2x1xf32> to vector<2x4xf32>
    %366 = vector.broadcast %364 : vector<1x4xf32> to vector<2x4xf32>
    %367 = arith.mulf %365, %366 : vector<2x4xf32>
    %368 = arith.addf %362, %367 : vector<2x4xf32>
    %369 = vector.extract_strided_slice %350 {offsets = [0, 3], sizes = [2, 1], strides = [1, 1]} : vector<2x4xf32> to vector<2x1xf32>
    %370 = vector.extract_strided_slice %4 {offsets = [3, 0], sizes = [1, 4], strides = [1, 1]} : vector<8x4xf32> to vector<1x4xf32>
    %371 = vector.broadcast %369 : vector<2x1xf32> to vector<2x4xf32>
    %372 = vector.broadcast %370 : vector<1x4xf32> to vector<2x4xf32>
    %373 = arith.mulf %371, %372 : vector<2x4xf32>
    %374 = arith.addf %368, %373 : vector<2x4xf32>
    %375 = vector.extract_strided_slice %323 {offsets = [0, 0], sizes = [2, 1], strides = [1, 1]} : vector<2x4xf32> to vector<2x1xf32>
    %376 = vector.extract_strided_slice %4 {offsets = [4, 0], sizes = [1, 4], strides = [1, 1]} : vector<8x4xf32> to vector<1x4xf32>
    %377 = vector.broadcast %375 : vector<2x1xf32> to vector<2x4xf32>
    %378 = vector.broadcast %376 : vector<1x4xf32> to vector<2x4xf32>
    %379 = arith.mulf %377, %378 : vector<2x4xf32>
    %380 = arith.addf %374, %379 : vector<2x4xf32>
    %381 = vector.extract_strided_slice %323 {offsets = [0, 1], sizes = [2, 1], strides = [1, 1]} : vector<2x4xf32> to vector<2x1xf32>
    %382 = vector.extract_strided_slice %4 {offsets = [5, 0], sizes = [1, 4], strides = [1, 1]} : vector<8x4xf32> to vector<1x4xf32>
    %383 = vector.broadcast %381 : vector<2x1xf32> to vector<2x4xf32>
    %384 = vector.broadcast %382 : vector<1x4xf32> to vector<2x4xf32>
    %385 = arith.mulf %383, %384 : vector<2x4xf32>
    %386 = arith.addf %380, %385 : vector<2x4xf32>
    %387 = vector.extract_strided_slice %323 {offsets = [0, 2], sizes = [2, 1], strides = [1, 1]} : vector<2x4xf32> to vector<2x1xf32>
    %388 = vector.extract_strided_slice %4 {offsets = [6, 0], sizes = [1, 4], strides = [1, 1]} : vector<8x4xf32> to vector<1x4xf32>
    %389 = vector.broadcast %387 : vector<2x1xf32> to vector<2x4xf32>
    %390 = vector.broadcast %388 : vector<1x4xf32> to vector<2x4xf32>
    %391 = arith.mulf %389, %390 : vector<2x4xf32>
    %392 = arith.addf %386, %391 : vector<2x4xf32>
    %393 = vector.extract_strided_slice %323 {offsets = [0, 3], sizes = [2, 1], strides = [1, 1]} : vector<2x4xf32> to vector<2x1xf32>
    %394 = vector.extract_strided_slice %4 {offsets = [7, 0], sizes = [1, 4], strides = [1, 1]} : vector<8x4xf32> to vector<1x4xf32>
    %395 = vector.broadcast %393 : vector<2x1xf32> to vector<2x4xf32>
    %396 = vector.broadcast %394 : vector<1x4xf32> to vector<2x4xf32>
    %397 = arith.mulf %395, %396 : vector<2x4xf32>
    %398 = arith.addf %392, %397 : vector<2x4xf32>
    %399 = math.tanh %398 : vector<2x4xf32>
    %400 = vector.extract_strided_slice %15 {offsets = [5, 0, 0], sizes = [1, 2, 4], strides = [1, 1, 1]} : vector<8x2x4xf32> to vector<1x2x4xf32>
    %401 = vector.shape_cast %400 : vector<1x2x4xf32> to vector<2x4xf32>
    %402 = vector.extract_strided_slice %350 {offsets = [0, 0], sizes = [2, 1], strides = [1, 1]} : vector<2x4xf32> to vector<2x1xf32>
    %403 = vector.extract_strided_slice %2 {offsets = [0, 0], sizes = [1, 4], strides = [1, 1]} : vector<4x4xf32> to vector<1x4xf32>
    %404 = vector.broadcast %402 : vector<2x1xf32> to vector<2x4xf32>
    %405 = vector.broadcast %403 : vector<1x4xf32> to vector<2x4xf32>
    %406 = arith.mulf %404, %405 : vector<2x4xf32>
    %407 = arith.addf %401, %406 : vector<2x4xf32>
    %408 = vector.extract_strided_slice %350 {offsets = [0, 1], sizes = [2, 1], strides = [1, 1]} : vector<2x4xf32> to vector<2x1xf32>
    %409 = vector.extract_strided_slice %2 {offsets = [1, 0], sizes = [1, 4], strides = [1, 1]} : vector<4x4xf32> to vector<1x4xf32>
    %410 = vector.broadcast %408 : vector<2x1xf32> to vector<2x4xf32>
    %411 = vector.broadcast %409 : vector<1x4xf32> to vector<2x4xf32>
    %412 = arith.mulf %410, %411 : vector<2x4xf32>
    %413 = arith.addf %407, %412 : vector<2x4xf32>
    %414 = vector.extract_strided_slice %350 {offsets = [0, 2], sizes = [2, 1], strides = [1, 1]} : vector<2x4xf32> to vector<2x1xf32>
    %415 = vector.extract_strided_slice %2 {offsets = [2, 0], sizes = [1, 4], strides = [1, 1]} : vector<4x4xf32> to vector<1x4xf32>
    %416 = vector.broadcast %414 : vector<2x1xf32> to vector<2x4xf32>
    %417 = vector.broadcast %415 : vector<1x4xf32> to vector<2x4xf32>
    %418 = arith.mulf %416, %417 : vector<2x4xf32>
    %419 = arith.addf %413, %418 : vector<2x4xf32>
    %420 = vector.extract_strided_slice %350 {offsets = [0, 3], sizes = [2, 1], strides = [1, 1]} : vector<2x4xf32> to vector<2x1xf32>
    %421 = vector.extract_strided_slice %2 {offsets = [3, 0], sizes = [1, 4], strides = [1, 1]} : vector<4x4xf32> to vector<1x4xf32>
    %422 = vector.broadcast %420 : vector<2x1xf32> to vector<2x4xf32>
    %423 = vector.broadcast %421 : vector<1x4xf32> to vector<2x4xf32>
    %424 = arith.mulf %422, %423 : vector<2x4xf32>
    %425 = arith.addf %419, %424 : vector<2x4xf32>
    %426 = math.tanh %425 : vector<2x4xf32>
    %427 = vector.extract_strided_slice %426 {offsets = [0, 0], sizes = [2, 1], strides = [1, 1]} : vector<2x4xf32> to vector<2x1xf32>
    %428 = vector.extract_strided_slice %4 {offsets = [0, 0], sizes = [1, 4], strides = [1, 1]} : vector<8x4xf32> to vector<1x4xf32>
    %429 = vector.broadcast %427 : vector<2x1xf32> to vector<2x4xf32>
    %430 = vector.broadcast %428 : vector<1x4xf32> to vector<2x4xf32>
    %431 = arith.mulf %429, %430 : vector<2x4xf32>
    %432 = arith.addf %17, %431 : vector<2x4xf32>
    %433 = vector.extract_strided_slice %426 {offsets = [0, 1], sizes = [2, 1], strides = [1, 1]} : vector<2x4xf32> to vector<2x1xf32>
    %434 = vector.extract_strided_slice %4 {offsets = [1, 0], sizes = [1, 4], strides = [1, 1]} : vector<8x4xf32> to vector<1x4xf32>
    %435 = vector.broadcast %433 : vector<2x1xf32> to vector<2x4xf32>
    %436 = vector.broadcast %434 : vector<1x4xf32> to vector<2x4xf32>
    %437 = arith.mulf %435, %436 : vector<2x4xf32>
    %438 = arith.addf %432, %437 : vector<2x4xf32>
    %439 = vector.extract_strided_slice %426 {offsets = [0, 2], sizes = [2, 1], strides = [1, 1]} : vector<2x4xf32> to vector<2x1xf32>
    %440 = vector.extract_strided_slice %4 {offsets = [2, 0], sizes = [1, 4], strides = [1, 1]} : vector<8x4xf32> to vector<1x4xf32>
    %441 = vector.broadcast %439 : vector<2x1xf32> to vector<2x4xf32>
    %442 = vector.broadcast %440 : vector<1x4xf32> to vector<2x4xf32>
    %443 = arith.mulf %441, %442 : vector<2x4xf32>
    %444 = arith.addf %438, %443 : vector<2x4xf32>
    %445 = vector.extract_strided_slice %426 {offsets = [0, 3], sizes = [2, 1], strides = [1, 1]} : vector<2x4xf32> to vector<2x1xf32>
    %446 = vector.extract_strided_slice %4 {offsets = [3, 0], sizes = [1, 4], strides = [1, 1]} : vector<8x4xf32> to vector<1x4xf32>
    %447 = vector.broadcast %445 : vector<2x1xf32> to vector<2x4xf32>
    %448 = vector.broadcast %446 : vector<1x4xf32> to vector<2x4xf32>
    %449 = arith.mulf %447, %448 : vector<2x4xf32>
    %450 = arith.addf %444, %449 : vector<2x4xf32>
    %451 = vector.extract_strided_slice %399 {offsets = [0, 0], sizes = [2, 1], strides = [1, 1]} : vector<2x4xf32> to vector<2x1xf32>
    %452 = vector.extract_strided_slice %4 {offsets = [4, 0], sizes = [1, 4], strides = [1, 1]} : vector<8x4xf32> to vector<1x4xf32>
    %453 = vector.broadcast %451 : vector<2x1xf32> to vector<2x4xf32>
    %454 = vector.broadcast %452 : vector<1x4xf32> to vector<2x4xf32>
    %455 = arith.mulf %453, %454 : vector<2x4xf32>
    %456 = arith.addf %450, %455 : vector<2x4xf32>
    %457 = vector.extract_strided_slice %399 {offsets = [0, 1], sizes = [2, 1], strides = [1, 1]} : vector<2x4xf32> to vector<2x1xf32>
    %458 = vector.extract_strided_slice %4 {offsets = [5, 0], sizes = [1, 4], strides = [1, 1]} : vector<8x4xf32> to vector<1x4xf32>
    %459 = vector.broadcast %457 : vector<2x1xf32> to vector<2x4xf32>
    %460 = vector.broadcast %458 : vector<1x4xf32> to vector<2x4xf32>
    %461 = arith.mulf %459, %460 : vector<2x4xf32>
    %462 = arith.addf %456, %461 : vector<2x4xf32>
    %463 = vector.extract_strided_slice %399 {offsets = [0, 2], sizes = [2, 1], strides = [1, 1]} : vector<2x4xf32> to vector<2x1xf32>
    %464 = vector.extract_strided_slice %4 {offsets = [6, 0], sizes = [1, 4], strides = [1, 1]} : vector<8x4xf32> to vector<1x4xf32>
    %465 = vector.broadcast %463 : vector<2x1xf32> to vector<2x4xf32>
    %466 = vector.broadcast %464 : vector<1x4xf32> to vector<2x4xf32>
    %467 = arith.mulf %465, %466 : vector<2x4xf32>
    %468 = arith.addf %462, %467 : vector<2x4xf32>
    %469 = vector.extract_strided_slice %399 {offsets = [0, 3], sizes = [2, 1], strides = [1, 1]} : vector<2x4xf32> to vector<2x1xf32>
    %470 = vector.extract_strided_slice %4 {offsets = [7, 0], sizes = [1, 4], strides = [1, 1]} : vector<8x4xf32> to vector<1x4xf32>
    %471 = vector.broadcast %469 : vector<2x1xf32> to vector<2x4xf32>
    %472 = vector.broadcast %470 : vector<1x4xf32> to vector<2x4xf32>
    %473 = arith.mulf %471, %472 : vector<2x4xf32>
    %474 = arith.addf %468, %473 : vector<2x4xf32>
    %475 = math.tanh %474 : vector<2x4xf32>
    %476 = vector.extract_strided_slice %15 {offsets = [6, 0, 0], sizes = [1, 2, 4], strides = [1, 1, 1]} : vector<8x2x4xf32> to vector<1x2x4xf32>
    %477 = vector.shape_cast %476 : vector<1x2x4xf32> to vector<2x4xf32>
    %478 = vector.extract_strided_slice %426 {offsets = [0, 0], sizes = [2, 1], strides = [1, 1]} : vector<2x4xf32> to vector<2x1xf32>
    %479 = vector.extract_strided_slice %2 {offsets = [0, 0], sizes = [1, 4], strides = [1, 1]} : vector<4x4xf32> to vector<1x4xf32>
    %480 = vector.broadcast %478 : vector<2x1xf32> to vector<2x4xf32>
    %481 = vector.broadcast %479 : vector<1x4xf32> to vector<2x4xf32>
    %482 = arith.mulf %480, %481 : vector<2x4xf32>
    %483 = arith.addf %477, %482 : vector<2x4xf32>
    %484 = vector.extract_strided_slice %426 {offsets = [0, 1], sizes = [2, 1], strides = [1, 1]} : vector<2x4xf32> to vector<2x1xf32>
    %485 = vector.extract_strided_slice %2 {offsets = [1, 0], sizes = [1, 4], strides = [1, 1]} : vector<4x4xf32> to vector<1x4xf32>
    %486 = vector.broadcast %484 : vector<2x1xf32> to vector<2x4xf32>
    %487 = vector.broadcast %485 : vector<1x4xf32> to vector<2x4xf32>
    %488 = arith.mulf %486, %487 : vector<2x4xf32>
    %489 = arith.addf %483, %488 : vector<2x4xf32>
    %490 = vector.extract_strided_slice %426 {offsets = [0, 2], sizes = [2, 1], strides = [1, 1]} : vector<2x4xf32> to vector<2x1xf32>
    %491 = vector.extract_strided_slice %2 {offsets = [2, 0], sizes = [1, 4], strides = [1, 1]} : vector<4x4xf32> to vector<1x4xf32>
    %492 = vector.broadcast %490 : vector<2x1xf32> to vector<2x4xf32>
    %493 = vector.broadcast %491 : vector<1x4xf32> to vector<2x4xf32>
    %494 = arith.mulf %492, %493 : vector<2x4xf32>
    %495 = arith.addf %489, %494 : vector<2x4xf32>
    %496 = vector.extract_strided_slice %426 {offsets = [0, 3], sizes = [2, 1], strides = [1, 1]} : vector<2x4xf32> to vector<2x1xf32>
    %497 = vector.extract_strided_slice %2 {offsets = [3, 0], sizes = [1, 4], strides = [1, 1]} : vector<4x4xf32> to vector<1x4xf32>
    %498 = vector.broadcast %496 : vector<2x1xf32> to vector<2x4xf32>
    %499 = vector.broadcast %497 : vector<1x4xf32> to vector<2x4xf32>
    %500 = arith.mulf %498, %499 : vector<2x4xf32>
    %501 = arith.addf %495, %500 : vector<2x4xf32>
    %502 = math.tanh %501 : vector<2x4xf32>
    %503 = vector.extract_strided_slice %502 {offsets = [0, 0], sizes = [2, 1], strides = [1, 1]} : vector<2x4xf32> to vector<2x1xf32>
    %504 = vector.extract_strided_slice %4 {offsets = [0, 0], sizes = [1, 4], strides = [1, 1]} : vector<8x4xf32> to vector<1x4xf32>
    %505 = vector.broadcast %503 : vector<2x1xf32> to vector<2x4xf32>
    %506 = vector.broadcast %504 : vector<1x4xf32> to vector<2x4xf32>
    %507 = arith.mulf %505, %506 : vector<2x4xf32>
    %508 = arith.addf %17, %507 : vector<2x4xf32>
    %509 = vector.extract_strided_slice %502 {offsets = [0, 1], sizes = [2, 1], strides = [1, 1]} : vector<2x4xf32> to vector<2x1xf32>
    %510 = vector.extract_strided_slice %4 {offsets = [1, 0], sizes = [1, 4], strides = [1, 1]} : vector<8x4xf32> to vector<1x4xf32>
    %511 = vector.broadcast %509 : vector<2x1xf32> to vector<2x4xf32>
    %512 = vector.broadcast %510 : vector<1x4xf32> to vector<2x4xf32>
    %513 = arith.mulf %511, %512 : vector<2x4xf32>
    %514 = arith.addf %508, %513 : vector<2x4xf32>
    %515 = vector.extract_strided_slice %502 {offsets = [0, 2], sizes = [2, 1], strides = [1, 1]} : vector<2x4xf32> to vector<2x1xf32>
    %516 = vector.extract_strided_slice %4 {offsets = [2, 0], sizes = [1, 4], strides = [1, 1]} : vector<8x4xf32> to vector<1x4xf32>
    %517 = vector.broadcast %515 : vector<2x1xf32> to vector<2x4xf32>
    %518 = vector.broadcast %516 : vector<1x4xf32> to vector<2x4xf32>
    %519 = arith.mulf %517, %518 : vector<2x4xf32>
    %520 = arith.addf %514, %519 : vector<2x4xf32>
    %521 = vector.extract_strided_slice %502 {offsets = [0, 3], sizes = [2, 1], strides = [1, 1]} : vector<2x4xf32> to vector<2x1xf32>
    %522 = vector.extract_strided_slice %4 {offsets = [3, 0], sizes = [1, 4], strides = [1, 1]} : vector<8x4xf32> to vector<1x4xf32>
    %523 = vector.broadcast %521 : vector<2x1xf32> to vector<2x4xf32>
    %524 = vector.broadcast %522 : vector<1x4xf32> to vector<2x4xf32>
    %525 = arith.mulf %523, %524 : vector<2x4xf32>
    %526 = arith.addf %520, %525 : vector<2x4xf32>
    %527 = vector.extract_strided_slice %475 {offsets = [0, 0], sizes = [2, 1], strides = [1, 1]} : vector<2x4xf32> to vector<2x1xf32>
    %528 = vector.extract_strided_slice %4 {offsets = [4, 0], sizes = [1, 4], strides = [1, 1]} : vector<8x4xf32> to vector<1x4xf32>
    %529 = vector.broadcast %527 : vector<2x1xf32> to vector<2x4xf32>
    %530 = vector.broadcast %528 : vector<1x4xf32> to vector<2x4xf32>
    %531 = arith.mulf %529, %530 : vector<2x4xf32>
    %532 = arith.addf %526, %531 : vector<2x4xf32>
    %533 = vector.extract_strided_slice %475 {offsets = [0, 1], sizes = [2, 1], strides = [1, 1]} : vector<2x4xf32> to vector<2x1xf32>
    %534 = vector.extract_strided_slice %4 {offsets = [5, 0], sizes = [1, 4], strides = [1, 1]} : vector<8x4xf32> to vector<1x4xf32>
    %535 = vector.broadcast %533 : vector<2x1xf32> to vector<2x4xf32>
    %536 = vector.broadcast %534 : vector<1x4xf32> to vector<2x4xf32>
    %537 = arith.mulf %535, %536 : vector<2x4xf32>
    %538 = arith.addf %532, %537 : vector<2x4xf32>
    %539 = vector.extract_strided_slice %475 {offsets = [0, 2], sizes = [2, 1], strides = [1, 1]} : vector<2x4xf32> to vector<2x1xf32>
    %540 = vector.extract_strided_slice %4 {offsets = [6, 0], sizes = [1, 4], strides = [1, 1]} : vector<8x4xf32> to vector<1x4xf32>
    %541 = vector.broadcast %539 : vector<2x1xf32> to vector<2x4xf32>
    %542 = vector.broadcast %540 : vector<1x4xf32> to vector<2x4xf32>
    %543 = arith.mulf %541, %542 : vector<2x4xf32>
    %544 = arith.addf %538, %543 : vector<2x4xf32>
    %545 = vector.extract_strided_slice %475 {offsets = [0, 3], sizes = [2, 1], strides = [1, 1]} : vector<2x4xf32> to vector<2x1xf32>
    %546 = vector.extract_strided_slice %4 {offsets = [7, 0], sizes = [1, 4], strides = [1, 1]} : vector<8x4xf32> to vector<1x4xf32>
    %547 = vector.broadcast %545 : vector<2x1xf32> to vector<2x4xf32>
    %548 = vector.broadcast %546 : vector<1x4xf32> to vector<2x4xf32>
    %549 = arith.mulf %547, %548 : vector<2x4xf32>
    %550 = arith.addf %544, %549 : vector<2x4xf32>
    %551 = math.tanh %550 : vector<2x4xf32>
    %552 = vector.extract_strided_slice %15 {offsets = [7, 0, 0], sizes = [1, 2, 4], strides = [1, 1, 1]} : vector<8x2x4xf32> to vector<1x2x4xf32>
    %553 = vector.shape_cast %552 : vector<1x2x4xf32> to vector<2x4xf32>
    %554 = vector.extract_strided_slice %502 {offsets = [0, 0], sizes = [2, 1], strides = [1, 1]} : vector<2x4xf32> to vector<2x1xf32>
    %555 = vector.extract_strided_slice %2 {offsets = [0, 0], sizes = [1, 4], strides = [1, 1]} : vector<4x4xf32> to vector<1x4xf32>
    %556 = vector.broadcast %554 : vector<2x1xf32> to vector<2x4xf32>
    %557 = vector.broadcast %555 : vector<1x4xf32> to vector<2x4xf32>
    %558 = arith.mulf %556, %557 : vector<2x4xf32>
    %559 = arith.addf %553, %558 : vector<2x4xf32>
    %560 = vector.extract_strided_slice %502 {offsets = [0, 1], sizes = [2, 1], strides = [1, 1]} : vector<2x4xf32> to vector<2x1xf32>
    %561 = vector.extract_strided_slice %2 {offsets = [1, 0], sizes = [1, 4], strides = [1, 1]} : vector<4x4xf32> to vector<1x4xf32>
    %562 = vector.broadcast %560 : vector<2x1xf32> to vector<2x4xf32>
    %563 = vector.broadcast %561 : vector<1x4xf32> to vector<2x4xf32>
    %564 = arith.mulf %562, %563 : vector<2x4xf32>
    %565 = arith.addf %559, %564 : vector<2x4xf32>
    %566 = vector.extract_strided_slice %502 {offsets = [0, 2], sizes = [2, 1], strides = [1, 1]} : vector<2x4xf32> to vector<2x1xf32>
    %567 = vector.extract_strided_slice %2 {offsets = [2, 0], sizes = [1, 4], strides = [1, 1]} : vector<4x4xf32> to vector<1x4xf32>
    %568 = vector.broadcast %566 : vector<2x1xf32> to vector<2x4xf32>
    %569 = vector.broadcast %567 : vector<1x4xf32> to vector<2x4xf32>
    %570 = arith.mulf %568, %569 : vector<2x4xf32>
    %571 = arith.addf %565, %570 : vector<2x4xf32>
    %572 = vector.extract_strided_slice %502 {offsets = [0, 3], sizes = [2, 1], strides = [1, 1]} : vector<2x4xf32> to vector<2x1xf32>
    %573 = vector.extract_strided_slice %2 {offsets = [3, 0], sizes = [1, 4], strides = [1, 1]} : vector<4x4xf32> to vector<1x4xf32>
    %574 = vector.broadcast %572 : vector<2x1xf32> to vector<2x4xf32>
    %575 = vector.broadcast %573 : vector<1x4xf32> to vector<2x4xf32>
    %576 = arith.mulf %574, %575 : vector<2x4xf32>
    %577 = arith.addf %571, %576 : vector<2x4xf32>
    %578 = math.tanh %577 : vector<2x4xf32>
    %579 = vector.extract_strided_slice %578 {offsets = [0, 0], sizes = [2, 1], strides = [1, 1]} : vector<2x4xf32> to vector<2x1xf32>
    %580 = vector.extract_strided_slice %4 {offsets = [0, 0], sizes = [1, 4], strides = [1, 1]} : vector<8x4xf32> to vector<1x4xf32>
    %581 = vector.broadcast %579 : vector<2x1xf32> to vector<2x4xf32>
    %582 = vector.broadcast %580 : vector<1x4xf32> to vector<2x4xf32>
    %583 = arith.mulf %581, %582 : vector<2x4xf32>
    %584 = arith.addf %17, %583 : vector<2x4xf32>
    %585 = vector.extract_strided_slice %578 {offsets = [0, 1], sizes = [2, 1], strides = [1, 1]} : vector<2x4xf32> to vector<2x1xf32>
    %586 = vector.extract_strided_slice %4 {offsets = [1, 0], sizes = [1, 4], strides = [1, 1]} : vector<8x4xf32> to vector<1x4xf32>
    %587 = vector.broadcast %585 : vector<2x1xf32> to vector<2x4xf32>
    %588 = vector.broadcast %586 : vector<1x4xf32> to vector<2x4xf32>
    %589 = arith.mulf %587, %588 : vector<2x4xf32>
    %590 = arith.addf %584, %589 : vector<2x4xf32>
    %591 = vector.extract_strided_slice %578 {offsets = [0, 2], sizes = [2, 1], strides = [1, 1]} : vector<2x4xf32> to vector<2x1xf32>
    %592 = vector.extract_strided_slice %4 {offsets = [2, 0], sizes = [1, 4], strides = [1, 1]} : vector<8x4xf32> to vector<1x4xf32>
    %593 = vector.broadcast %591 : vector<2x1xf32> to vector<2x4xf32>
    %594 = vector.broadcast %592 : vector<1x4xf32> to vector<2x4xf32>
    %595 = arith.mulf %593, %594 : vector<2x4xf32>
    %596 = arith.addf %590, %595 : vector<2x4xf32>
    %597 = vector.extract_strided_slice %578 {offsets = [0, 3], sizes = [2, 1], strides = [1, 1]} : vector<2x4xf32> to vector<2x1xf32>
    %598 = vector.extract_strided_slice %4 {offsets = [3, 0], sizes = [1, 4], strides = [1, 1]} : vector<8x4xf32> to vector<1x4xf32>
    %599 = vector.broadcast %597 : vector<2x1xf32> to vector<2x4xf32>
    %600 = vector.broadcast %598 : vector<1x4xf32> to vector<2x4xf32>
    %601 = arith.mulf %599, %600 : vector<2x4xf32>
    %602 = arith.addf %596, %601 : vector<2x4xf32>
    %603 = vector.extract_strided_slice %551 {offsets = [0, 0], sizes = [2, 1], strides = [1, 1]} : vector<2x4xf32> to vector<2x1xf32>
    %604 = vector.extract_strided_slice %4 {offsets = [4, 0], sizes = [1, 4], strides = [1, 1]} : vector<8x4xf32> to vector<1x4xf32>
    %605 = vector.broadcast %603 : vector<2x1xf32> to vector<2x4xf32>
    %606 = vector.broadcast %604 : vector<1x4xf32> to vector<2x4xf32>
    %607 = arith.mulf %605, %606 : vector<2x4xf32>
    %608 = arith.addf %602, %607 : vector<2x4xf32>
    %609 = vector.extract_strided_slice %551 {offsets = [0, 1], sizes = [2, 1], strides = [1, 1]} : vector<2x4xf32> to vector<2x1xf32>
    %610 = vector.extract_strided_slice %4 {offsets = [5, 0], sizes = [1, 4], strides = [1, 1]} : vector<8x4xf32> to vector<1x4xf32>
    %611 = vector.broadcast %609 : vector<2x1xf32> to vector<2x4xf32>
    %612 = vector.broadcast %610 : vector<1x4xf32> to vector<2x4xf32>
    %613 = arith.mulf %611, %612 : vector<2x4xf32>
    %614 = arith.addf %608, %613 : vector<2x4xf32>
    %615 = vector.extract_strided_slice %551 {offsets = [0, 2], sizes = [2, 1], strides = [1, 1]} : vector<2x4xf32> to vector<2x1xf32>
    %616 = vector.extract_strided_slice %4 {offsets = [6, 0], sizes = [1, 4], strides = [1, 1]} : vector<8x4xf32> to vector<1x4xf32>
    %617 = vector.broadcast %615 : vector<2x1xf32> to vector<2x4xf32>
    %618 = vector.broadcast %616 : vector<1x4xf32> to vector<2x4xf32>
    %619 = arith.mulf %617, %618 : vector<2x4xf32>
    %620 = arith.addf %614, %619 : vector<2x4xf32>
    %621 = vector.extract_strided_slice %551 {offsets = [0, 3], sizes = [2, 1], strides = [1, 1]} : vector<2x4xf32> to vector<2x1xf32>
    %622 = vector.extract_strided_slice %4 {offsets = [7, 0], sizes = [1, 4], strides = [1, 1]} : vector<8x4xf32> to vector<1x4xf32>
    %623 = vector.broadcast %621 : vector<2x1xf32> to vector<2x4xf32>
    %624 = vector.broadcast %622 : vector<1x4xf32> to vector<2x4xf32>
    %625 = arith.mulf %623, %624 : vector<2x4xf32>
    %626 = arith.addf %620, %625 : vector<2x4xf32>
    %627 = math.tanh %626 : vector<2x4xf32>
    %628 = vector.shape_cast %7 : vector<1x1xf32> to vector<1x1xf32>
    %629 = vector.broadcast %628 : vector<1x1xf32> to vector<2x1xf32>
    %630 = vector.extract_strided_slice %627 {offsets = [0, 0], sizes = [2, 1], strides = [1, 1]} : vector<2x4xf32> to vector<2x1xf32>
    %631 = vector.extract_strided_slice %6 {offsets = [0, 0], sizes = [1, 1], strides = [1, 1]} : vector<4x1xf32> to vector<1x1xf32>
    %632 = vector.broadcast %631 : vector<1x1xf32> to vector<2x1xf32>
    %633 = arith.mulf %630, %632 : vector<2x1xf32>
    %634 = arith.addf %629, %633 : vector<2x1xf32>
    %635 = vector.extract_strided_slice %627 {offsets = [0, 1], sizes = [2, 1], strides = [1, 1]} : vector<2x4xf32> to vector<2x1xf32>
    %636 = vector.extract_strided_slice %6 {offsets = [1, 0], sizes = [1, 1], strides = [1, 1]} : vector<4x1xf32> to vector<1x1xf32>
    %637 = vector.broadcast %636 : vector<1x1xf32> to vector<2x1xf32>
    %638 = arith.mulf %635, %637 : vector<2x1xf32>
    %639 = arith.addf %634, %638 : vector<2x1xf32>
    %640 = vector.extract_strided_slice %627 {offsets = [0, 2], sizes = [2, 1], strides = [1, 1]} : vector<2x4xf32> to vector<2x1xf32>
    %641 = vector.extract_strided_slice %6 {offsets = [2, 0], sizes = [1, 1], strides = [1, 1]} : vector<4x1xf32> to vector<1x1xf32>
    %642 = vector.broadcast %641 : vector<1x1xf32> to vector<2x1xf32>
    %643 = arith.mulf %640, %642 : vector<2x1xf32>
    %644 = arith.addf %639, %643 : vector<2x1xf32>
    %645 = vector.extract_strided_slice %627 {offsets = [0, 3], sizes = [2, 1], strides = [1, 1]} : vector<2x4xf32> to vector<2x1xf32>
    %646 = vector.extract_strided_slice %6 {offsets = [3, 0], sizes = [1, 1], strides = [1, 1]} : vector<4x1xf32> to vector<1x1xf32>
    %647 = vector.broadcast %646 : vector<1x1xf32> to vector<2x1xf32>
    %648 = arith.mulf %645, %647 : vector<2x1xf32>
    %649 = arith.addf %644, %648 : vector<2x1xf32>
    %c0_16 = arith.constant 0 : index
    %c0_17 = arith.constant 0 : index
    %650 = vector.load %arg8[%c0_16, %c0_17] : memref<2x1xf32, #tpu.memory_space<vmem>>, vector<2x1xf32>
    tpu.vector_store %arg8[%c0_16, %c0_17], %649 {strides = array<i32>} : memref<2x1xf32, #tpu.memory_space<vmem>>, vector<2x1xf32>,
    return
  }
}

</mosaic_0001>

<bundles_post_ra>
// kernel: tpu_custom_call.1
= control target key start
LH: loop header
LB: loop body
LE: loop exit
PB: predicated region body
PF: predicated region fallthrough
CT: control target
= control target key end

     0   :  { %v39_v0 = vlaneseq  ;;  %v807_v5 = vmov 1   ;;  %v808_v6 = vmov 0   ;;  %v809_v29 = vmov 2   ;;  %s811_s13 = smov 1   ;;  %s813_s14 = smov 2   ;;  %s1166_s0 = inlined_call_operand.vmem [shape: f32[8,2], index: 0, kind: input, shape index: {}]   ;;  %s1167_s2 = inlined_call_operand.vmem [shape: f32[4,4], index: 2, kind: input, shape index: {}]   ;;  %s1168_s1 = inlined_call_operand.vmem [shape: f32[1,4], index: 1, kind: input, shape index: {}]   ;;  %s1169_s3 = inlined_call_operand.vmem [shape: f32[1,4], index: 3, kind: input, shape index: {}]   ;;  %s1170_s4 = inlined_call_operand.vmem [shape: f32[8,4], index: 4, kind: input, shape index: {}]   ;;  %s1171_s5 = inlined_call_operand.vmem [shape: f32[1,4], index: 5, kind: input, shape index: {}]   ;;  %s1172_s6 = inlined_call_operand.vmem [shape: f32[4,1], index: 6, kind: input, shape index: {}]   ;;  %s1173_s7 = inlined_call_operand.<no memory space> [shape: f32[1,1], index: 7, kind: input, shape index: {}]   ;;  %s1174_s8 = inlined_call_operand.vmem [shape: f32[2,1], index: 8, kind: output, shape index: {}]  }
   0x1   :  { %v867_v2 = vld [vmem:[%s1166_s0] sm:$0xff]  ;;  %715 = vset.pattern.permute.xlu1 %v807_v5  ;;  %714 = vset.pattern.permute.xlu0 %v808_v6  ;;  %v810_v30 = vmov 3   ;;  %s815_s17 = smov 126   ;;  %s816_s18 = smov 125   ;;  %vm694_vm0 = vcmask 1024  }
   0x2   :  { %v862_v1 = vshrl.u32 %v39_v0, 7  ;;  %v33_v7 = vld [vmem:[%s1167_s2] sm:$0xf] }
   0x3   :  { %v891_v11 = vld [vmem:[%s1168_s1] ss:$0 sm:$0xff] }
   0x4   :  { %v870_v3 = vsub.s32 0, %v862_v1  ;;  %v880_v8 = vsub.s32 1, %v862_v1  ;;  %v883_v9 = vsub.s32 2, %v862_v1  ;;  %v894_v12 = vsub.s32 3, %v862_v1  ;;  %v902_v14 = vld [vmem:[%s1169_s3] ss:$0 sm:$0xff] }
   0x5   :  { %v35_v33 = vld [vmem:[%s1170_s4] sm:$0xff]  ;;  %v69_v39 = vsub.s32 4, %v862_v1  ;;  %v76_v44 = vsub.s32 5, %v862_v1  ;;  %v83_v51 = vsub.s32 6, %v862_v1  ;;  %v90_v59 = vsub.s32 7, %v862_v1 }
   0x6   :  { %v42_v4 = vrot.slane %v867_v2, %v870_v3  ;;  %v886_v10 = vrot.slane %v33_v7, %v870_v3  ;;  %v897_v13 = vrot.slane %v33_v7, %v880_v8  ;;  %v905_v16 = vrot.slane %v33_v7, %v883_v9  ;;  %v936_v37 = vld [vmem:[%s1171_s5] ss:$0 sm:$0xff] }
   0x7   :  { %v910_v19 = vrot.slane %v33_v7, %v894_v12  ;;  %v49_v31 = vrot.slane %v867_v2, %v880_v8  ;;  %v56_v32 = vrot.slane %v867_v2, %v883_v9  ;;  %v928_v34 = vrot.slane %v35_v33, %v870_v3 }
   0x8   :  { %44 = vbcast.lane.b32.xlu0 %v42_v4, 256  ;;  %v133_v17 = vmul.f32 0.0, %v886_v10  ;;  %v139_v20 = vmul.f32 0.0, %v897_v13  ;;  %v145_v22 = vmul.f32 0.0, %v905_v16  ;;  %v931_v35 = vrot.slane %v35_v33, %v880_v8 }
   0x9   :  { %v151_v24 = vmul.f32 0.0, %v910_v19  ;;  %v941_v41 = vrot.slane %v35_v33, %v883_v9  ;;  %v947_v45 = vrot.slane %v35_v33, %v894_v12  ;;  %v951_v46 = vrot.slane %v35_v33, %v69_v39 }
   0xa   :  { %v957_v52 = vrot.slane %v35_v33, %v76_v44  ;;  %v966_v61 = vrot.slane %v35_v33, %v83_v51 }
   0xb   :  { %v199_v54 = vmul.f32 0.0, %v951_v46 }
   0xc   :  { %v205_v60 = vmul.f32 0.0, %v957_v52 }
  0x7a   :  { %v45_v15 = vpop.permute.xlu0 %44 }
  0x7b   :  { %v101_v18 = vmul.f32 %v891_v11, %v45_v15  ;;  %v211_v15 = vmul.f32 0.0, %v966_v61 }
  0x7d   :  { %v115_v21 = vadd.f32 %v902_v14, %v101_v18 }
  0x7f   :  { %v134_v23 = vadd.f32 %v133_v17, %v115_v21  ;;  %v974_v17 = vrot.slane %v35_v33, %v90_v59 }
  0x81   :  { %v140_v25 = vadd.f32 %v139_v20, %v134_v23 }
  0x83   :  { %v146_v26 = vadd.f32 %v145_v22, %v140_v25 }
  0x85   :  { %v152_v27 = vadd.f32 %v151_v24, %v146_v26  ;;  %v217_v24 = vmul.f32 0.0, %v974_v17 }
  0x87   :  { %775 = vtanh.f32 %v152_v27 }
  0x91   :  { %v776_v28 = vpop.eup %775 }
  0x92   :  { %166 = vperm.xlu1 %715, %v776_v28   ;;  %156 = vperm.xlu0 %714, %v776_v28  }
  0x96   :  { %716 = vset.pattern.permute.xlu1 %v809_v29  ;;  %717 = vset.pattern.permute.xlu0 %v810_v30 }
  0x97   :  { %176 = vperm.xlu1 %716, %v776_v28   ;;  %186 = vperm.xlu0 %717, %v776_v28  }
  0x9b   :  { %51 = vbcast.lane.b32.xlu1 %v49_v31, 256  ;;  %720 = vset.pattern.permute.xlu0 %v809_v29 }
  0x9c   :  { %718 = vset.pattern.permute.xlu1 %v808_v6 }
  0x9f   :  { %58 = vbcast.lane.b32.xlu1 %v56_v32, 256  ;;  %v63_v32 = vrot.slane %v867_v2, %v894_v12 }
 0x111   :  { %v167_v36 = vpop.permute.xlu1 %166  ;;  %v157_v38 = vpop.permute.xlu0 %156 }
 0x112   :  { %v163_v40 = vmul.f32 %v928_v34, %v157_v38  ;;  %v173_v42 = vmul.f32 %v931_v35, %v167_v36  ;;  %v220_v62 = vmul.f32 %v157_v38, %v886_v10  ;;  %v222_v4 = vmul.f32 %v167_v36, %v897_v13 }
 0x114   :  { %v164_v43 = vadd.f32 %v936_v37, %v163_v40 }
 0x116   :  { %v177_v47 = vpop.permute.xlu1 %176  ;;  %v174_v48 = vadd.f32 %v173_v42, %v164_v43  ;;  %v187_v49 = vpop.permute.xlu0 %186 }
 0x117   :  { %v183_v50 = vmul.f32 %v941_v41, %v177_v47  ;;  %v193_v55 = vmul.f32 %v947_v45, %v187_v49  ;;  %v224_v20 = vmul.f32 %v177_v47, %v905_v16  ;;  %v226_v22 = vmul.f32 %v187_v49, %v910_v19 }
 0x119   :  { %v184_v53 = vadd.f32 %v183_v50, %v174_v48 }
 0x11a   :  { %v52_v56 = vpop.permute.xlu1 %51 }
 0x11b   :  { %v194_v57 = vadd.f32 %v193_v55, %v184_v53  ;;  %v102_v58 = vmul.f32 %v891_v11, %v52_v56 }
 0x11d   :  { %v200_v63 = vadd.f32 %v199_v54, %v194_v57  ;;  %v116_v0 = vadd.f32 %v902_v14, %v102_v58 }
 0x11e   :  { %v59_v33 = vpop.permute.xlu1 %58 }
 0x11f   :  { %v221_v7 = vadd.f32 %v220_v62, %v116_v0  ;;  %v206_v18 = vadd.f32 %v205_v60, %v200_v63  ;;  %v103_v36 = vmul.f32 %v891_v11, %v59_v33 }
 0x121   :  { %v223_v21 = vadd.f32 %v222_v4, %v221_v7  ;;  %v212_v25 = vadd.f32 %v211_v15, %v206_v18  ;;  %v117_v43 = vadd.f32 %v902_v14, %v103_v36 }
 0x123   :  { %v225_v23 = vadd.f32 %v224_v20, %v223_v21  ;;  %v218_v27 = vadd.f32 %v217_v24, %v212_v25 }
 0x125   :  { %v227_v26 = vadd.f32 %v226_v22, %v225_v23 }
 0x127   :  { %777 = vtanh.f32 %v227_v26 }
 0x128   :  { %779 = vtanh.f32 %v218_v27 }
 0x131   :  { %v778_v28 = vpop.eup %777 }
 0x132   :  { %243 = vperm.xlu0 %720, %v778_v28   ;;  %231 = vperm.xlu1 %718, %v778_v28   ;;  %v780_v31 = vpop.eup %779 }
 0x136   :  { %722 = vset.pattern.permute.xlu0 %v808_v6  ;;  %719 = vset.pattern.permute.xlu1 %v807_v5 }
 0x137   :  { %256 = vperm.xlu0 %722, %v780_v31   ;;  %237 = vperm.xlu1 %719, %v778_v28  }
 0x13b   :  { %725 = vset.pattern.permute.xlu0 %v810_v30  ;;  %721 = vset.pattern.permute.xlu1 %v810_v30 }
 0x13c   :  { %274 = vperm.xlu0 %725, %v780_v31   ;;  %249 = vperm.xlu1 %721, %v778_v28  }
 0x140   :  { %723 = vset.pattern.permute.xlu1 %v807_v5  ;;  %728 = vset.pattern.permute.xlu0 %v809_v29 }
 0x141   :  { %262 = vperm.xlu1 %723, %v780_v31  }
 0x145   :  { %724 = vset.pattern.permute.xlu1 %v809_v29 }
 0x146   :  { %268 = vperm.xlu1 %724, %v780_v31  }
 0x14a   :  { %65 = vbcast.lane.b32.xlu1 %v63_v32, 256 }
 0x14b   :  { %726 = vset.pattern.permute.xlu1 %v808_v6 }
 0x1b1   :  { %v232_v38 = vpop.permute.xlu1 %231  ;;  %v244_v47 = vpop.permute.xlu0 %243 }
 0x1b2   :  { %v234_v40 = vmul.f32 %v232_v38, %v928_v34  ;;  %v280_v42 = vmul.f32 %v232_v38, %v886_v10  ;;  %v246_v55 = vmul.f32 %v244_v47, %v941_v41  ;;  %v284_v56 = vmul.f32 %v244_v47, %v905_v16 }
 0x1b3   :  { %v70_v38 = vrot.slane %v867_v2, %v69_v39 }
 0x1b4   :  { %v235_v49 = vadd.f32 %v936_v37, %v234_v40  ;;  %v281_v50 = vadd.f32 %v280_v42, %v117_v43 }
 0x1b6   :  { %v238_v48 = vpop.permute.xlu1 %237  ;;  %v257_v7 = vpop.permute.xlu0 %256 }
 0x1b7   :  { %v240_v53 = vmul.f32 %v238_v48, %v931_v35  ;;  %v282_v54 = vmul.f32 %v238_v48, %v897_v13  ;;  %v259_v20 = vmul.f32 %v257_v7, %v951_v46 }
 0x1b9   :  { %v241_v57 = vadd.f32 %v240_v53, %v235_v49  ;;  %v283_v58 = vadd.f32 %v282_v54, %v281_v50 }
 0x1bb   :  { %v247_v60 = vadd.f32 %v246_v55, %v241_v57  ;;  %v285_v62 = vadd.f32 %v284_v56, %v283_v58  ;;  %v250_v63 = vpop.permute.xlu1 %249  ;;  %v275_v24 = vpop.permute.xlu0 %274 }
 0x1bc   :  { %v252_v0 = vmul.f32 %v250_v63, %v947_v45  ;;  %v286_v4 = vmul.f32 %v250_v63, %v910_v19  ;;  %v277_v28 = vmul.f32 %v275_v24, %v974_v17 }
 0x1be   :  { %v253_v15 = vadd.f32 %v252_v0, %v247_v60  ;;  %v287_v18 = vadd.f32 %v286_v4, %v285_v62 }
 0x1c0   :  { %781 = vtanh.f32 %v287_v18  ;;  %v263_v21 = vpop.permute.xlu1 %262  ;;  %v260_v22 = vadd.f32 %v259_v20, %v253_v15 }
 0x1c1   :  { %v265_v23 = vmul.f32 %v263_v21, %v957_v52 }
 0x1c3   :  { %v266_v26 = vadd.f32 %v265_v23, %v260_v22 }
 0x1c5   :  { %v269_v25 = vpop.permute.xlu1 %268 }
 0x1c6   :  { %v271_v27 = vmul.f32 %v269_v25, %v966_v61 }
 0x1c8   :  { %v272_v31 = vadd.f32 %v271_v27, %v266_v26 }
 0x1c9   :  { %v66_v40 = vpop.permute.xlu1 %65 }
 0x1ca   :  { %v782_v32 = vpop.eup %781  ;;  %v278_v33 = vadd.f32 %v277_v28, %v272_v31  ;;  %v104_v42 = vmul.f32 %v891_v11, %v66_v40 }
 0x1cb   :  { %303 = vperm.xlu0 %728, %v782_v32   ;;  %291 = vperm.xlu1 %726, %v782_v32  }
 0x1cc   :  { %783 = vtanh.f32 %v278_v33  ;;  %v118_v49 = vadd.f32 %v902_v14, %v104_v42  ;;  %v77_v42 = vrot.slane %v867_v2, %v76_v44 }
 0x1cf   :  { %727 = vset.pattern.permute.xlu1 %v807_v5  ;;  %730 = vset.pattern.permute.xlu0 %v808_v6 }
 0x1d0   :  { %297 = vperm.xlu1 %727, %v782_v32  }
 0x1d4   :  { %729 = vset.pattern.permute.xlu1 %v810_v30 }
 0x1d5   :  { %309 = vperm.xlu1 %729, %v782_v32  }
 0x1d6   :  { %v784_v36 = vpop.eup %783 }
 0x1d7   :  { %316 = vperm.xlu0 %730, %v784_v36  }
 0x1d9   :  { %731 = vset.pattern.permute.xlu1 %v807_v5 }
 0x1da   :  { %322 = vperm.xlu1 %731, %v784_v36  }
 0x1db   :  { %733 = vset.pattern.permute.xlu0 %v810_v30 }
 0x1dc   :  { %334 = vperm.xlu0 %733, %v784_v36  }
 0x1de   :  { %732 = vset.pattern.permute.xlu1 %v809_v29 }
 0x1df   :  { %328 = vperm.xlu1 %732, %v784_v36  }
 0x1e0   :  { %736 = vset.pattern.permute.xlu0 %v809_v29 }
 0x1e3   :  { %72 = vbcast.lane.b32.xlu1 %v70_v38, 256 }
 0x1e4   :  { %734 = vset.pattern.permute.xlu1 %v808_v6 }
 0x24a   :  { %v292_v43 = vpop.permute.xlu1 %291  ;;  %v304_v50 = vpop.permute.xlu0 %303 }
 0x24b   :  { %v294_v47 = vmul.f32 %v292_v43, %v928_v34  ;;  %v340_v48 = vmul.f32 %v292_v43, %v886_v10  ;;  %v306_v57 = vmul.f32 %v304_v50, %v941_v41  ;;  %v344_v58 = vmul.f32 %v304_v50, %v905_v16 }
 0x24d   :  { %v295_v54 = vadd.f32 %v936_v37, %v294_v47  ;;  %v341_v39 = vadd.f32 %v340_v48, %v118_v49 }
 0x24f   :  { %v298_v53 = vpop.permute.xlu1 %297 }
 0x250   :  { %v300_v55 = vmul.f32 %v298_v53, %v931_v35  ;;  %v342_v56 = vmul.f32 %v298_v53, %v897_v13 }
 0x252   :  { %v301_v60 = vadd.f32 %v300_v55, %v295_v54  ;;  %v343_v62 = vadd.f32 %v342_v56, %v341_v39 }
 0x254   :  { %v307_v63 = vadd.f32 %v306_v57, %v301_v60  ;;  %v345_v0 = vadd.f32 %v344_v58, %v343_v62  ;;  %v310_v4 = vpop.permute.xlu1 %309 }
 0x255   :  { %v312_v7 = vmul.f32 %v310_v4, %v947_v45  ;;  %v346_v15 = vmul.f32 %v310_v4, %v910_v19 }
 0x256   :  { %v317_v18 = vpop.permute.xlu0 %316 }
 0x257   :  { %v313_v20 = vadd.f32 %v312_v7, %v307_v63  ;;  %v347_v21 = vadd.f32 %v346_v15, %v345_v0  ;;  %v319_v22 = vmul.f32 %v317_v18, %v951_v46 }
 0x259   :  { %785 = vtanh.f32 %v347_v21  ;;  %v323_v23 = vpop.permute.xlu1 %322  ;;  %v320_v24 = vadd.f32 %v319_v22, %v313_v20 }
 0x25a   :  { %v325_v25 = vmul.f32 %v323_v23, %v957_v52 }
 0x25b   :  { %v335_v26 = vpop.permute.xlu0 %334 }
 0x25c   :  { %v326_v28 = vadd.f32 %v325_v25, %v320_v24  ;;  %v337_v32 = vmul.f32 %v335_v26, %v974_v17 }
 0x25e   :  { %v329_v27 = vpop.permute.xlu1 %328 }
 0x25f   :  { %v331_v31 = vmul.f32 %v329_v27, %v966_v61 }
 0x261   :  { %v332_v33 = vadd.f32 %v331_v31, %v326_v28 }
 0x262   :  { %v73_v43 = vpop.permute.xlu1 %72 }
 0x263   :  { %v786_v36 = vpop.eup %785  ;;  %v338_v38 = vadd.f32 %v337_v32, %v332_v33  ;;  %v105_v47 = vmul.f32 %v891_v11, %v73_v43  ;;  %v84_v43 = vrot.slane %v867_v2, %v83_v51 }
 0x264   :  { %363 = vperm.xlu0 %736, %v786_v36   ;;  %351 = vperm.xlu1 %734, %v786_v36  }
 0x265   :  { %787 = vtanh.f32 %v338_v38  ;;  %v119_v53 = vadd.f32 %v902_v14, %v105_v47 }
 0x268   :  { %735 = vset.pattern.permute.xlu1 %v807_v5  ;;  %738 = vset.pattern.permute.xlu0 %v808_v6 }
 0x269   :  { %357 = vperm.xlu1 %735, %v786_v36  }
 0x26d   :  { %737 = vset.pattern.permute.xlu1 %v810_v30 }
 0x26e   :  { %369 = vperm.xlu1 %737, %v786_v36  }
 0x26f   :  { %v788_v40 = vpop.eup %787 }
 0x270   :  { %376 = vperm.xlu0 %738, %v788_v40  }
 0x272   :  { %739 = vset.pattern.permute.xlu1 %v807_v5 }
 0x273   :  { %382 = vperm.xlu1 %739, %v788_v40  }
 0x274   :  { %741 = vset.pattern.permute.xlu0 %v810_v30 }
 0x275   :  { %394 = vperm.xlu0 %741, %v788_v40  }
 0x277   :  { %740 = vset.pattern.permute.xlu1 %v809_v29 }
 0x278   :  { %388 = vperm.xlu1 %740, %v788_v40  }
 0x279   :  { %744 = vset.pattern.permute.xlu0 %v809_v29 }
 0x27c   :  { %79 = vbcast.lane.b32.xlu1 %v77_v42, 256 }
 0x27d   :  { %742 = vset.pattern.permute.xlu1 %v808_v6 }
 0x2e3   :  { %v352_v48 = vpop.permute.xlu1 %351  ;;  %v364_v54 = vpop.permute.xlu0 %363 }
 0x2e4   :  { %v354_v49 = vmul.f32 %v352_v48, %v928_v34  ;;  %v400_v50 = vmul.f32 %v352_v48, %v886_v10  ;;  %v366_v58 = vmul.f32 %v364_v54, %v941_v41  ;;  %v404_v60 = vmul.f32 %v364_v54, %v905_v16 }
 0x2e6   :  { %v355_v55 = vadd.f32 %v936_v37, %v354_v49  ;;  %v401_v44 = vadd.f32 %v400_v50, %v119_v53 }
 0x2e8   :  { %v358_v39 = vpop.permute.xlu1 %357 }
 0x2e9   :  { %v360_v56 = vmul.f32 %v358_v39, %v931_v35  ;;  %v402_v57 = vmul.f32 %v358_v39, %v897_v13 }
 0x2eb   :  { %v361_v62 = vadd.f32 %v360_v56, %v355_v55  ;;  %v403_v63 = vadd.f32 %v402_v57, %v401_v44 }
 0x2ed   :  { %v367_v0 = vadd.f32 %v366_v58, %v361_v62  ;;  %v405_v4 = vadd.f32 %v404_v60, %v403_v63  ;;  %v370_v7 = vpop.permute.xlu1 %369 }
 0x2ee   :  { %v372_v15 = vmul.f32 %v370_v7, %v947_v45  ;;  %v406_v18 = vmul.f32 %v370_v7, %v910_v19 }
 0x2ef   :  { %v377_v20 = vpop.permute.xlu0 %376 }
 0x2f0   :  { %v373_v21 = vadd.f32 %v372_v15, %v367_v0  ;;  %v407_v22 = vadd.f32 %v406_v18, %v405_v4  ;;  %v379_v23 = vmul.f32 %v377_v20, %v951_v46 }
 0x2f2   :  { %789 = vtanh.f32 %v407_v22  ;;  %v383_v24 = vpop.permute.xlu1 %382  ;;  %v380_v25 = vadd.f32 %v379_v23, %v373_v21 }
 0x2f3   :  { %v385_v26 = vmul.f32 %v383_v24, %v957_v52 }
 0x2f4   :  { %v395_v27 = vpop.permute.xlu0 %394 }
 0x2f5   :  { %v386_v31 = vadd.f32 %v385_v26, %v380_v25  ;;  %v397_v33 = vmul.f32 %v395_v27, %v974_v17 }
 0x2f7   :  { %v389_v28 = vpop.permute.xlu1 %388 }
 0x2f8   :  { %v391_v32 = vmul.f32 %v389_v28, %v966_v61 }
 0x2fa   :  { %v392_v36 = vadd.f32 %v391_v32, %v386_v31 }
 0x2fb   :  { %v80_v47 = vpop.permute.xlu1 %79 }
 0x2fc   :  { %v790_v38 = vpop.eup %789  ;;  %v398_v40 = vadd.f32 %v397_v33, %v392_v36  ;;  %v106_v48 = vmul.f32 %v891_v11, %v80_v47 }
 0x2fd   :  { %423 = vperm.xlu0 %744, %v790_v38   ;;  %411 = vperm.xlu1 %742, %v790_v38  }
 0x2fe   :  { %791 = vtanh.f32 %v398_v40  ;;  %v120_v54 = vadd.f32 %v902_v14, %v106_v48 }
 0x301   :  { %743 = vset.pattern.permute.xlu1 %v807_v5  ;;  %746 = vset.pattern.permute.xlu0 %v808_v6 }
 0x302   :  { %417 = vperm.xlu1 %743, %v790_v38  }
 0x306   :  { %745 = vset.pattern.permute.xlu1 %v810_v30 }
 0x307   :  { %429 = vperm.xlu1 %745, %v790_v38  }
 0x308   :  { %v792_v42 = vpop.eup %791 }
 0x309   :  { %436 = vperm.xlu0 %746, %v792_v42  }
 0x30b   :  { %747 = vset.pattern.permute.xlu1 %v807_v5 }
 0x30c   :  { %442 = vperm.xlu1 %747, %v792_v42  }
 0x30d   :  { %749 = vset.pattern.permute.xlu0 %v810_v30 }
 0x30e   :  { %454 = vperm.xlu0 %749, %v792_v42  }
 0x310   :  { %748 = vset.pattern.permute.xlu1 %v809_v29 }
 0x311   :  { %448 = vperm.xlu1 %748, %v792_v42  }
 0x312   :  { %752 = vset.pattern.permute.xlu0 %v809_v29 }
 0x315   :  { %86 = vbcast.lane.b32.xlu1 %v84_v43, 256  ;;  %v91_v43 = vrot.slane %v867_v2, %v90_v59 }
 0x316   :  { %750 = vset.pattern.permute.xlu1 %v808_v6 }
 0x37c   :  { %v412_v49 = vpop.permute.xlu1 %411  ;;  %v424_v39 = vpop.permute.xlu0 %423 }
 0x37d   :  { %v414_v50 = vmul.f32 %v412_v49, %v928_v34  ;;  %v460_v53 = vmul.f32 %v412_v49, %v886_v10  ;;  %v426_v58 = vmul.f32 %v424_v39, %v941_v41  ;;  %v464_v60 = vmul.f32 %v424_v39, %v905_v16 }
 0x37f   :  { %v415_v44 = vadd.f32 %v936_v37, %v414_v50  ;;  %v461_v51 = vadd.f32 %v460_v53, %v120_v54 }
 0x381   :  { %v418_v55 = vpop.permute.xlu1 %417 }
 0x382   :  { %v420_v56 = vmul.f32 %v418_v55, %v931_v35  ;;  %v462_v57 = vmul.f32 %v418_v55, %v897_v13 }
 0x384   :  { %v421_v62 = vadd.f32 %v420_v56, %v415_v44  ;;  %v463_v63 = vadd.f32 %v462_v57, %v461_v51 }
 0x386   :  { %v427_v0 = vadd.f32 %v426_v58, %v421_v62  ;;  %v465_v4 = vadd.f32 %v464_v60, %v463_v63  ;;  %v430_v7 = vpop.permute.xlu1 %429 }
 0x387   :  { %v432_v15 = vmul.f32 %v430_v7, %v947_v45  ;;  %v466_v18 = vmul.f32 %v430_v7, %v910_v19 }
 0x388   :  { %v437_v20 = vpop.permute.xlu0 %436 }
 0x389   :  { %v433_v21 = vadd.f32 %v432_v15, %v427_v0  ;;  %v467_v22 = vadd.f32 %v466_v18, %v465_v4  ;;  %v439_v23 = vmul.f32 %v437_v20, %v951_v46 }
 0x38b   :  { %793 = vtanh.f32 %v467_v22  ;;  %v443_v24 = vpop.permute.xlu1 %442  ;;  %v440_v25 = vadd.f32 %v439_v23, %v433_v21 }
 0x38c   :  { %v445_v26 = vmul.f32 %v443_v24, %v957_v52 }
 0x38d   :  { %v455_v27 = vpop.permute.xlu0 %454 }
 0x38e   :  { %v446_v31 = vadd.f32 %v445_v26, %v440_v25  ;;  %v457_v33 = vmul.f32 %v455_v27, %v974_v17 }
 0x390   :  { %v449_v28 = vpop.permute.xlu1 %448 }
 0x391   :  { %v451_v32 = vmul.f32 %v449_v28, %v966_v61 }
 0x393   :  { %v452_v36 = vadd.f32 %v451_v32, %v446_v31 }
 0x394   :  { %v87_v47 = vpop.permute.xlu1 %86 }
 0x395   :  { %v794_v38 = vpop.eup %793  ;;  %v458_v40 = vadd.f32 %v457_v33, %v452_v36  ;;  %v107_v48 = vmul.f32 %v891_v11, %v87_v47 }
 0x396   :  { %483 = vperm.xlu0 %752, %v794_v38   ;;  %471 = vperm.xlu1 %750, %v794_v38  }
 0x397   :  { %795 = vtanh.f32 %v458_v40  ;;  %v121_v54 = vadd.f32 %v902_v14, %v107_v48 }
 0x39a   :  { %751 = vset.pattern.permute.xlu1 %v807_v5  ;;  %754 = vset.pattern.permute.xlu0 %v808_v6 }
 0x39b   :  { %477 = vperm.xlu1 %751, %v794_v38  }
 0x39f   :  { %753 = vset.pattern.permute.xlu1 %v810_v30 }
 0x3a0   :  { %489 = vperm.xlu1 %753, %v794_v38  }
 0x3a1   :  { %v796_v42 = vpop.eup %795 }
 0x3a2   :  { %496 = vperm.xlu0 %754, %v796_v42  }
 0x3a4   :  { %755 = vset.pattern.permute.xlu1 %v807_v5 }
 0x3a5   :  { %502 = vperm.xlu1 %755, %v796_v42  }
 0x3a6   :  { %757 = vset.pattern.permute.xlu0 %v810_v30 }
 0x3a7   :  { %514 = vperm.xlu0 %757, %v796_v42  }
 0x3a9   :  { %756 = vset.pattern.permute.xlu1 %v809_v29 }
 0x3aa   :  { %508 = vperm.xlu1 %756, %v796_v42  }
 0x3ab   :  { %760 = vset.pattern.permute.xlu0 %v809_v29 }
 0x3ae   :  { %93 = vbcast.lane.b32.xlu1 %v91_v43, 256 }
 0x3af   :  { %758 = vset.pattern.permute.xlu1 %v808_v6 }
 0x415   :  { %v472_v49 = vpop.permute.xlu1 %471  ;;  %v484_v39 = vpop.permute.xlu0 %483 }
 0x416   :  { %v474_v50 = vmul.f32 %v472_v49, %v928_v34  ;;  %v520_v53 = vmul.f32 %v472_v49, %v886_v10  ;;  %v486_v51 = vmul.f32 %v484_v39, %v941_v41  ;;  %v524_v56 = vmul.f32 %v484_v39, %v905_v16 }
 0x418   :  { %v475_v1 = vadd.f32 %v936_v37, %v474_v50  ;;  %v521_v2 = vadd.f32 %v520_v53, %v121_v54 }
 0x41a   :  { %v478_v55 = vpop.permute.xlu1 %477 }
 0x41b   :  { %v480_v59 = vmul.f32 %v478_v55, %v931_v35  ;;  %v522_v44 = vmul.f32 %v478_v55, %v897_v13 }
 0x41d   :  { %v481_v57 = vadd.f32 %v480_v59, %v475_v1  ;;  %v523_v58 = vadd.f32 %v522_v44, %v521_v2 }
 0x41f   :  { %v487_v60 = vadd.f32 %v486_v51, %v481_v57  ;;  %v525_v62 = vadd.f32 %v524_v56, %v523_v58  ;;  %v490_v63 = vpop.permute.xlu1 %489 }
 0x420   :  { %v492_v0 = vmul.f32 %v490_v63, %v947_v45  ;;  %v526_v4 = vmul.f32 %v490_v63, %v910_v19 }
 0x421   :  { %v497_v7 = vpop.permute.xlu0 %496 }
 0x422   :  { %v493_v15 = vadd.f32 %v492_v0, %v487_v60  ;;  %v527_v18 = vadd.f32 %v526_v4, %v525_v62  ;;  %v499_v20 = vmul.f32 %v497_v7, %v951_v46 }
 0x424   :  { %797 = vtanh.f32 %v527_v18  ;;  %v503_v21 = vpop.permute.xlu1 %502  ;;  %v500_v22 = vadd.f32 %v499_v20, %v493_v15 }
 0x425   :  { %v505_v23 = vmul.f32 %v503_v21, %v957_v52 }
 0x426   :  { %v515_v24 = vpop.permute.xlu0 %514 }
 0x427   :  { %v506_v26 = vadd.f32 %v505_v23, %v500_v22  ;;  %v517_v28 = vmul.f32 %v515_v24, %v974_v17  ;;  %v1137_v22 = vld [vmem:[%s1172_s6] sm:$0xf]  ;;  %s812_s6 = smov 3  }
 0x428   :  { %v655_v24 = vrot.slane %v1137_v22, %v880_v8  ;;  %v669_v8 = vrot.slane %v1137_v22, %v883_v9 }
 0x429   :  { %v509_v25 = vpop.permute.xlu1 %508 }
 0x42a   :  { %v511_v27 = vmul.f32 %v509_v25, %v966_v61 }
 0x42c   :  { %v512_v31 = vadd.f32 %v511_v27, %v506_v26 }
 0x42d   :  { %v94_v38 = vpop.permute.xlu1 %93 }
 0x42e   :  { %v798_v32 = vpop.eup %797  ;;  %v518_v33 = vadd.f32 %v517_v28, %v512_v31  ;;  %v108_v40 = vmul.f32 %v891_v11, %v94_v38 }
 0x42f   :  { %543 = vperm.xlu0 %760, %v798_v32   ;;  %531 = vperm.xlu1 %758, %v798_v32  }
 0x430   :  { %799 = vtanh.f32 %v518_v33  ;;  %v122_v48 = vadd.f32 %v902_v14, %v108_v40 }
 0x433   :  { %759 = vset.pattern.permute.xlu1 %v807_v5  ;;  %762 = vset.pattern.permute.xlu0 %v808_v6 }
 0x434   :  { %537 = vperm.xlu1 %759, %v798_v32  }
 0x438   :  { %761 = vset.pattern.permute.xlu1 %v810_v30 }
 0x439   :  { %549 = vperm.xlu1 %761, %v798_v32  }
 0x43a   :  { %v800_v36 = vpop.eup %799 }
 0x43b   :  { %556 = vperm.xlu0 %762, %v800_v36  }
 0x43d   :  { %763 = vset.pattern.permute.xlu1 %v807_v5 }
 0x43e   :  { %562 = vperm.xlu1 %763, %v800_v36  }
 0x43f   :  { %765 = vset.pattern.permute.xlu0 %v810_v30 }
 0x440   :  { %574 = vperm.xlu0 %765, %v800_v36  }
 0x442   :  { %764 = vset.pattern.permute.xlu1 %v809_v29 }
 0x443   :  { %568 = vperm.xlu1 %764, %v800_v36  }
 0x444   :  { %768 = vset.pattern.permute.xlu0 %v809_v29 }
 0x447   :  { %766 = vset.pattern.permute.xlu1 %v808_v6 }
 0x4ae   :  { %v532_v42 = vpop.permute.xlu1 %531  ;;  %v544_v49 = vpop.permute.xlu0 %543 }
 0x4af   :  { %v534_v43 = vmul.f32 %v532_v42, %v928_v34  ;;  %v580_v47 = vmul.f32 %v532_v42, %v886_v10  ;;  %v546_v1 = vmul.f32 %v544_v49, %v941_v41  ;;  %v584_v11 = vmul.f32 %v544_v49, %v905_v16 }
 0x4b1   :  { %v535_v53 = vadd.f32 %v936_v37, %v534_v43  ;;  %v581_v54 = vadd.f32 %v580_v47, %v122_v48 }
 0x4b3   :  { %v538_v50 = vpop.permute.xlu1 %537 }
 0x4b4   :  { %v540_v39 = vmul.f32 %v538_v50, %v931_v35  ;;  %v582_v55 = vmul.f32 %v538_v50, %v897_v13 }
 0x4b6   :  { %v541_v2 = vadd.f32 %v540_v39, %v535_v53  ;;  %v583_v59 = vadd.f32 %v582_v55, %v581_v54 }
 0x4b8   :  { %v547_v44 = vadd.f32 %v546_v1, %v541_v2  ;;  %v585_v51 = vadd.f32 %v584_v11, %v583_v59  ;;  %v550_v10 = vpop.permute.xlu1 %549 }
 0x4b9   :  { %v552_v14 = vmul.f32 %v550_v10, %v947_v45  ;;  %v586_v56 = vmul.f32 %v550_v10, %v910_v19 }
 0x4ba   :  { %v557_v57 = vpop.permute.xlu0 %556 }
 0x4bb   :  { %v553_v58 = vadd.f32 %v552_v14, %v547_v44  ;;  %v587_v60 = vadd.f32 %v586_v56, %v585_v51  ;;  %v559_v62 = vmul.f32 %v557_v57, %v951_v46 }
 0x4bd   :  { %801 = vtanh.f32 %v587_v60  ;;  %v563_v13 = vpop.permute.xlu1 %562  ;;  %v560_v63 = vadd.f32 %v559_v62, %v553_v58 }
 0x4be   :  { %v565_v0 = vmul.f32 %v563_v13, %v957_v52 }
 0x4bf   :  { %v575_v16 = vpop.permute.xlu0 %574 }
 0x4c0   :  { %v566_v7 = vadd.f32 %v565_v0, %v560_v63  ;;  %v577_v18 = vmul.f32 %v575_v16, %v974_v17 }
 0x4c2   :  { %v569_v4 = vpop.permute.xlu1 %568 }
 0x4c3   :  { %v571_v15 = vmul.f32 %v569_v4, %v966_v61 }
 0x4c5   :  { %v572_v20 = vadd.f32 %v571_v15, %v566_v7 }
 0x4c7   :  { %v802_v21 = vpop.eup %801  ;;  %v578_v19 = vadd.f32 %v577_v18, %v572_v20 }
 0x4c8   :  { %603 = vperm.xlu0 %768, %v802_v21   ;;  %591 = vperm.xlu1 %766, %v802_v21  }
 0x4c9   :  { %803 = vtanh.f32 %v578_v19 }
 0x4cc   :  { %767 = vset.pattern.permute.xlu1 %v807_v5  ;;  %771 = vset.pattern.permute.xlu0 %v807_v5  ;;  %v683_v5 = vrot.slane %v1137_v22, %v894_v12 }
 0x4cd   :  { %597 = vperm.xlu1 %767, %v802_v21  }
 0x4d1   :  { %769 = vset.pattern.permute.xlu1 %v810_v30 }
 0x4d2   :  { %609 = vperm.xlu1 %769, %v802_v21  }
 0x4d3   :  { %v804_v23 = vpop.eup %803 }
 0x4d4   :  { %622 = vperm.xlu0 %771, %v804_v23  }
 0x4d6   :  { %770 = vset.pattern.permute.xlu1 %v808_v6  ;;  %v13_v6 = vstv %s1173_s7  ;;  %s814_s7 = smov 127  }
 0x4d7   :  { %616 = vperm.xlu1 %770, %v804_v23   ;;  %14 = vst [vmem:[#allocation2] sm:$0x1] %v13_v6 }
 0x4d8   :  { %657 = vrot.lane.b32.xlu0 %v655_v24, %s811_s13 }
 0x4d9   :  { %774 = vset.pattern.permute.xlu0 %v810_v30 }
 0x4db   :  { %772 = vset.pattern.permute.xlu1 %v809_v29 }
 0x4dc   :  { %628 = vperm.xlu1 %772, %v804_v23   ;;  %685 = vrot.lane.b32.xlu0 %v683_v5, %s812_s6 }
 0x4e0   :  { %773 = vset.pattern.permute.xlu1 %v810_v30 }
 0x4e1   :  { %634 = vperm.xlu1 %773, %v804_v23  }
 0x4e5   :  { %671 = vrot.lane.b32.xlu1 %v669_v8, %s813_s14 }
 0x547   :  { %v592_v12 = vpop.permute.xlu1 %591  ;;  %v604_v30 = vpop.permute.xlu0 %603 }
 0x548   :  { %v594_v25 = vmul.f32 %v592_v12, %v928_v34  ;;  %v606_v31 = vmul.f32 %v604_v30, %v941_v41 }
 0x54a   :  { %v595_v26 = vadd.f32 %v936_v37, %v594_v25 }
 0x54c   :  { %v598_v29 = vpop.permute.xlu1 %597 }
 0x54d   :  { %v600_v27 = vmul.f32 %v598_v29, %v931_v35 }
 0x54f   :  { %v601_v28 = vadd.f32 %v600_v27, %v595_v26 }
 0x551   :  { %v610_v9 = vpop.permute.xlu1 %609  ;;  %v607_v32 = vadd.f32 %v606_v31, %v601_v28 }
 0x552   :  { %v612_v33 = vmul.f32 %v610_v9, %v947_v45 }
 0x553   :  { %v623_v42 = vpop.permute.xlu0 %622 }
 0x554   :  { %v613_v38 = vadd.f32 %v612_v33, %v607_v32  ;;  %v625_v34 = vmul.f32 %v623_v42, %v957_v52 }
 0x556   :  { %v617_v36 = vpop.permute.xlu1 %616 }
 0x557   :  { %v619_v40 = vmul.f32 %v617_v36, %v951_v46  ;;  %v658_v53 = vpop.permute.xlu0 %657 }
 0x559   :  { %v620_v43 = vadd.f32 %v619_v40, %v613_v38 }
 0x55b   :  { %v629_v47 = vpop.permute.xlu1 %628  ;;  %v626_v37 = vadd.f32 %v625_v34, %v620_v43  ;;  %v686_v46 = vpop.permute.xlu0 %685 }
 0x55c   :  { %v631_v35 = vmul.f32 %v629_v47, %v966_v61  ;;  %v649_v61 = vrot.slane %v1137_v22, %v870_v3 }
 0x55e   :  { %v632_v49 = vadd.f32 %v631_v35, %v626_v37 }
 0x560   :  { %v635_v48 = vpop.permute.xlu1 %634 }
 0x561   :  { %v637_v41 = vmul.f32 %v635_v48, %v974_v17  ;;  %v703_v17 = vld [vmem:[#allocation2] ss:$0 sm:$0xff] }
 0x563   :  { %v638_v50 = vadd.f32 %v637_v41, %v632_v49 }
 0x564   :  { %v672_v45 = vpop.permute.xlu1 %671 }
 0x565   :  { %805 = vtanh.f32 %v638_v50 }
 0x56f   :  { %v806_v54 = vpop.eup %805 }
 0x570   :  { %v660_v39 = vmul.f32 %v806_v54, %v658_v53  ;;  %v674_v55 = vmul.f32 %v806_v54, %v672_v45  ;;  %v688_v52 = vmul.f32 %v806_v54, %v686_v46  ;;  %v650_v1 = vmul.f32 %v806_v54, %v649_v61 }
 0x572   :  { %662 = vrot.lane.b32.xlu1 %v660_v39, %s814_s7  ;;  %676 = vrot.lane.b32.xlu0 %v674_v55, %s815_s17  ;;  %v651_v11 = vadd.f32 %v703_v17, %v650_v1 }
 0x576   :  { %690 = vrot.lane.b32.xlu1 %v688_v52, %s816_s18 }
 0x5e4   :  { %v663_v2 = vpop.permute.xlu1 %662  ;;  %v677_v44 = vpop.permute.xlu0 %676 }
 0x5e5   :  { %v665_v59 = vadd.f32 %v663_v2, %v651_v11 }
 0x5e7   :  { %v679_v51 = vadd.f32 %v677_v44, %v665_v59 }
 0x5e8   :  { %v691_v10 = vpop.permute.xlu1 %690 }
 0x5e9   :  { %v693_v14 = vadd.f32 %v691_v10, %v679_v51 }
 0x5eb   :  { %695 = vst.msk [vmem:[%s1174_s8] sm:$0x3] %vm694_vm0, %v693_v14 }

</bundles_post_ra>
